<compile_context>
chip_gen: v7x
topology: tpu7x:2x2x1
jax: 0.10.0
libtpu: 0.0.40
codegen_flags: <defaults>
</compile_context>

<pallas_src>
import math

import jax
import jax.numpy as jnp
from jax.experimental import pallas as pl
from jax.experimental.pallas import tpu as pltpu


# ----------------------------------------------------------------------------------------
# Elementwise helpers shared by the kernel and the pure-JAX reference.
# ----------------------------------------------------------------------------------------

_PI = math.pi
# sin(pi*r), cos(pi*r) on r in [-0.5, 0.5]; |err| < ~5e-7 (Taylor/Horner).
_SIN_COEFFS = (_PI, -_PI**3 / 6.0, _PI**5 / 120.0, -_PI**7 / 5040.0,
               _PI**9 / 362880.0, -_PI**11 / 39916800.0)
_COS_COEFFS = (1.0, -_PI**2 / 2.0, _PI**4 / 24.0, -_PI**6 / 720.0,
               _PI**8 / 40320.0, -_PI**10 / 3628800.0)


def _sin_cos_pi(x):
    """sin(pi*x), cos(pi*x) for arbitrary x: range-reduce to [-0.5, 0.5] + polynomial.
    Pure VPU ops (floor/mul/add) -> no transcendental lowering needed inside the kernel."""
    n = jnp.floor(x + 0.5)                                   # nearest integer
    r = x - n                                                # r in [-0.5, 0.5]
    sign = 1.0 - 2.0 * (n - 2.0 * jnp.floor(0.5 * n))        # (-1)^n
    r2 = r * r
    s = _SIN_COEFFS[-1]
    for cf in reversed(_SIN_COEFFS[:-1]):
        s = s * r2 + cf
    s = s * r
    c = _COS_COEFFS[-1]
    for cf in reversed(_COS_COEFFS[:-1]):
        c = c * r2 + cf
    return sign * s, sign * c


def _sh16_terms(x, y, z):
    """Real spherical harmonics, degrees 0..3 (tcnn 'degree 4' -> 16 coeffs). Elementwise."""
    xx, yy, zz = x * x, y * y, z * z
    xy, yz, xz = x * y, y * z, x * z
    return [
        jnp.full_like(x, 0.28209479177387814),
        -0.48860251190291987 * y,
        0.48860251190291987 * z,
        -0.48860251190291987 * x,
        1.0925484305920792 * xy,
        -1.0925484305920792 * yz,
        0.94617469575755997 * zz - 0.31539156525251999,
        -1.0925484305920792 * xz,
        0.54627421529603959 * (xx - yy),
        0.59004358992664352 * y * (-3.0 * xx + yy),
        2.8906114426405538 * xy * z,
        0.45704579946446572 * y * (1.0 - 5.0 * zz),
        0.3731763325901154 * z * (5.0 * zz - 3.0),
        0.45704579946446572 * x * (1.0 - 5.0 * zz),
        1.4453057213202769 * z * (xx - yy),
        0.59004358992664352 * x * (-xx + 3.0 * yy),
    ]


# ----------------------------------------------------------------------------------------
# Pallas kernel: fused encode + MLP + sigmoid (points-on-lanes layout)
# ----------------------------------------------------------------------------------------

def _make_rgb_kernel(n_layers, multires, feat_pad, compute_dtype):
    pos_dim = 3 + 6 * multires            # identity + sin/cos per octave (39 for multires=6)
    dir_dim = 16                          # SH degree 4

    def kernel(p_ref, d_ref, *rest):
        wb = rest[:2 * n_layers]
        o_ref = rest[2 * n_layers]
        feat = rest[2 * n_layers + 1]     # VMEM scratch (feat_pad, T) f32

        p = p_ref[...]                    # (3, T), already divided by bb/2
        t = p.shape[1]

        # ---- positional frequency encoding (lane-dense, VPU only) -------------------
        feat[0:3, :] = p
        s, c = _sin_cos_pi(p)             # base octave sin/cos(pi*p)
        feat[3:6, :] = s
        feat[6:9, :] = c
        for k in range(1, multires):      # double-angle recurrence -> sin/cos(2^k*pi*p)
            s, c = 2.0 * s * c, c * c - s * s
            feat[3 + 6 * k: 6 + 6 * k, :] = s
            feat[6 + 6 * k: 9 + 6 * k, :] = c

        # ---- view-direction encoding: normalize (rsqrt on EUP) + SH deg 4 -----------
        d = d_ref[...]                    # (3, T)
        x, y, z = d[0:1, :], d[1:2, :], d[2:3, :]
        inv_n = jax.lax.rsqrt(x * x + y * y + z * z + 1e-12)
        x, y, z = x * inv_n, y * inv_n, z * inv_n
        for i, row in enumerate(_sh16_terms(x, y, z)):       # (1, T) rows
            feat[pos_dim + i: pos_dim + i + 1, :] = row

        # Zero the pad rows: the padded W0 columns are zero, but 0 * stale-NaN would
        # otherwise poison valid lanes through the sublane contraction.
        feat[pos_dim + dir_dim: feat_pad, :] = jnp.zeros(
            (feat_pad - pos_dim - dir_dim, t), jnp.float32)

        # ---- MLP: h = W_t @ h + b, ReLU; last layer linear; sigmoid -----------------
        h = feat[...].astype(compute_dtype)                   # (feat_pad, T)
        for i in range(n_layers):
            w = wb[2 * i][...]                                # (d_out, d_in) compute dtype
            b = wb[2 * i + 1][...]                            # (d_out, 1)    f32
            h = jnp.dot(w, h, preferred_element_type=jnp.float32) + b
            if i < n_layers - 1:                              # last_layer_linear=True
                h = jnp.maximum(h, 0.0).astype(compute_dtype)
        o_ref[...] = jax.nn.sigmoid(h).astype(o_ref.dtype)    # lane-dense (out_ch, T) store

    return kernel


def _auto_row_tile(n):
    t = -(-n // 2)                  # aim for >= 2 grid steps (keeps both v7x TCs busy)
    t = -(-t // 512) * 512          # lane-dense multiple of 512
    return max(512, min(4096, t))


def rgb_mlp_forward(p_t, d_t, weights_t, biases_t, *, out_channels, multires, feat_pad,
                    row_tile=None, compute_dtype=jnp.bfloat16):
    """p_t, d_t: (3, N) f32.  weights_t[i]: (d_out, d_in) in compute dtype (layer 0 padded to
    feat_pad).  biases_t[i]: (d_out, 1) f32.  Returns (out_channels, N) f32."""
    c, n = p_t.shape
    n_layers = len(weights_t)
    if row_tile is None:
        row_tile = _auto_row_tile(n)

    in_specs = [pl.BlockSpec((c, row_tile), lambda i: (0, i)),
                pl.BlockSpec((d_t.shape[0], row_tile), lambda i: (0, i))]
    args = [p_t, d_t]
    for w, b in zip(weights_t, biases_t):
        # Grid-invariant weights/biases (~17 KB total); constant index_map keeps them
        # resident in VMEM across grid steps.
        in_specs.append(pl.BlockSpec(w.shape, lambda i: (0, 0)))
        in_specs.append(pl.BlockSpec(b.shape, lambda i: (0, 0)))
        args.append(w)
        args.append(b)

    # No host-side padding: cdiv grid, Pallas masks the partial edge block (garbage lanes
    # compute garbage but their stores are dropped; the contraction is over sublanes so
    # they never contaminate valid lanes).
    return pl.pallas_call(
        _make_rgb_kernel(n_layers, multires, feat_pad, compute_dtype),
        out_shape=jax.ShapeDtypeStruct((out_channels, n), jnp.float32),
        grid_spec=pltpu.PrefetchScalarGridSpec(
            num_scalar_prefetch=0,
            grid=(pl.cdiv(n, row_tile),),
            in_specs=in_specs,
            out_specs=pl.BlockSpec((out_channels, row_tile), lambda i: (0, i)),
            scratch_shapes=[pltpu.VMEM((feat_pad, row_tile), jnp.float32)],
        ),
        compiler_params=pltpu.CompilerParams(dimension_semantics=("parallel",)),
    )(*args)


# ----------------------------------------------------------------------------------------
# RGB module (JAX wrapper)
# ----------------------------------------------------------------------------------------

class RGBPallas:
    """JAX/Pallas port of volsurfs RGB: sigmoid(MLP(concat(freq_enc(points), sh_enc(dirs))))."""

    def __init__(self, in_channels=3, mlp_layers_dims=(64, 64), out_channels=3,
                 pos_dep=True, view_dep=True, sh_deg=4, multires=6, bb_sides=2.0,
                 row_tile=None, compute_dtype=jnp.bfloat16, key=None):
        assert (pos_dep and in_channels > 0) or (not pos_dep and in_channels == 0)
        # TODO(synk): only the pos_dep+view_dep frequency/SH configuration is implemented;
        # normal_dep / geom_feat_dep inputs and hash-grid / Lipshitz-MLP variants are not in
        # the provided source.
        assert pos_dep and view_dep, "Pallas path implements pos_dep=True, view_dep=True"
        assert in_channels == 3
        if key is None:
            key = jax.random.PRNGKey(0)
        self.in_channels = in_channels
        self.out_channels = out_channels
        self.multires = multires
        self.sh_deg = sh_deg
        self.row_tile = row_tile
        self.compute_dtype = compute_dtype

        bb = jnp.asarray(bb_sides, jnp.float32)
        if bb.ndim == 0:
            bb = jnp.full((in_channels,), bb, jnp.float32)
        self.inv_half_bb = (2.0 / bb).reshape(1, in_channels)          # points / (bb/2)

        self.pos_out_dim = in_channels + in_channels * 2 * multires    # 39
        self.dir_out_dim = 16                                          # SH degree 4
        mlp_in = self.pos_out_dim + self.dir_out_dim                   # 55
        self.feat_pad = -(-mlp_in // 16) * 16                          # 64: clean bf16 packing

        dims = [mlp_in] + list(mlp_layers_dims) + [out_channels]
        self.weights, self.biases = [], []     # reference orientation: (d_in,d_out), (1,d_out)
        for i in range(len(dims) - 1):
            key, wk, bk = jax.random.split(key, 3)
            w = jax.random.normal(wk, (dims[i], dims[i + 1]), jnp.float32) * math.sqrt(2.0 / dims[i])
            b = 0.01 * jax.random.normal(bk, (1, dims[i + 1]), jnp.float32)
            self.weights.append(w)
            self.biases.append(b)

        # Kernel-side parameters prepared ONCE: transposed (d_out, d_in), first layer zero-
        # padded to d_in=feat_pad, cached in compute_dtype; biases as f32 column vectors.
        self._weights_t = []
        for i, w in enumerate(self.weights):
            wt = w.T
            if i == 0:
                wt = jnp.pad(wt, ((0, 0), (0, self.feat_pad - wt.shape[1])))
            self._weights_t.append(wt)
        self._weights_t_cd = [w.astype(compute_dtype) for w in self._weights_t]
        self._biases_col = [b.reshape(-1, 1) for b in self.biases]

    def __call__(self, points=None, samples_dirs=None, compute_dtype=None):
        cd = self.compute_dtype if compute_dtype is None else compute_dtype
        if jnp.dtype(cd) == jnp.dtype(self.compute_dtype):
            w_t = self._weights_t_cd                       # cached, no per-call cast
        else:
            w_t = [w.astype(cd) for w in self._weights_t]  # test-only path (e.g. f32)
        # Layout plumbing only: XLA fuses normalize + cast + transpose into one small pass.
        p_t = (points.astype(jnp.float32) * self.inv_half_bb).T        # (3, N)
        d_t = samples_dirs.astype(jnp.float32).T                       # (3, N)
        out_t = rgb_mlp_forward(p_t, d_t, w_t, self._biases_col,
                                out_channels=self.out_channels, multires=self.multires,
                                feat_pad=self.feat_pad, row_tile=self.row_tile,
                                compute_dtype=cd)
        return out_t.T                                                 # (N, out_channels) f32


# ----------------------------------------------------------------------------------------
# Pure-JAX reference (row-major layout, true sin/cos base octave, HIGHEST-precision matmuls)
# ----------------------------------------------------------------------------------------

def _reference(model, points, dirs):
    p = points.astype(jnp.float32) * model.inv_half_bb
    s0 = jnp.sin(math.pi * p)
    c0 = jnp.cos(math.pi * p)
    feats = [p, s0, c0]
    s, c = s0, c0
    for _ in range(model.multires - 1):
        s, c = 2.0 * s * c, c * c - s * s
        feats.append(s)
        feats.append(c)
    d = dirs.astype(jnp.float32)
    x, y, z = d[:, 0:1], d[:, 1:2], d[:, 2:3]
    inv_n = jax.lax.rsqrt(x * x + y * y + z * z + 1e-12)
    x, y, z = x * inv_n, y * inv_n, z * inv_n
    feats.extend(_sh16_terms(x, y, z))
    h = jnp.concatenate(feats, axis=1)                     # (N, 55)
    for i, (w, b) in enumerate(zip(model.weights, model.biases)):
        h = jnp.dot(h, w, precision=jax.lax.Precision.HIGHEST) + b
        if i < len(model.weights) - 1:
            h = jnp.maximum(h, 0.0)
    return jax.nn.sigmoid(h)


if __name__ == "__main__":
    key = jax.random.PRNGKey(0)
    kp, kd = jax.random.split(key)
    N = 320                                    # deliberately NOT a multiple of the row tile
    points = jax.random.uniform(kp, (N, 3), jnp.float32, minval=-1.0, maxval=1.0)
    dirs = jax.random.normal(kd, (N, 3), jnp.float32)

    # Small row tile for the demo: exercises a 2-step grid plus a masked partial edge block.
    # Production leaves row_tile=None (auto: 512-4096, >=2 grid steps for v7x megacore).
    model = RGBPallas(in_channels=3, mlp_layers_dims=(64, 64), out_channels=3,
                      sh_deg=4, bb_sides=2.0, row_tile=256, key=jax.random.PRNGKey(0))

    ref = _reference(model, points, dirs)

    # f32 compute path: tight check against the pure-JAX reference.
    rgb_f32 = jax.block_until_ready(
        model(points=points, samples_dirs=dirs, compute_dtype=jnp.float32))
    assert rgb_f32.shape == (N, 3)
    assert bool(jnp.all(jnp.isfinite(rgb_f32)))
    assert float(jnp.max(jnp.abs(rgb_f32 - ref))) < 1e-3, "f32 path mismatch vs reference"

    # Default bf16-matmul path (native MXU dtype on v6e/v7x; f32 accumulation).
    rgb_bf16 = jax.block_until_ready(model(points=points, samples_dirs=dirs))
    assert rgb_bf16.shape == (N, 3)
    assert float(jnp.max(jnp.abs(rgb_bf16 - ref))) < 5e-2, "bf16 path mismatch vs reference"

    print("KERNEL_OK")
</pallas_src>

<mosaic_0001>
module attributes {stable_mosaic.version = 11 : i64} {
  func.func @kernel(%arg0: i32, %arg1: memref<3x256xf32, #tpu.memory_space<vmem>>, %arg2: memref<3x256xf32, #tpu.memory_space<vmem>>, %arg3: memref<64x64xf32, #tpu.memory_space<vmem>>, %arg4: memref<64x1xf32, #tpu.memory_space<vmem>>, %arg5: memref<64x64xf32, #tpu.memory_space<vmem>>, %arg6: memref<64x1xf32, #tpu.memory_space<vmem>>, %arg7: memref<3x64xf32, #tpu.memory_space<vmem>>, %arg8: memref<3x1xf32, #tpu.memory_space<vmem>>, %arg9: memref<3x256xf32, #tpu.memory_space<vmem>>, %arg10: memref<64x256xf32, #tpu.memory_space<vmem>>) attributes {dimension_semantics = [#tpu.dimension_semantics<parallel>], iteration_bounds = array<i64: 2>, scalar_prefetch = 0 : i64, scratch_operands = 1 : i64, tpu.core_type = #tpu.core_type<tc>, window_params = [{transform_indices = @transform_0, window_bounds = array<i64: 3, 256>}, {transform_indices = @transform_1, window_bounds = array<i64: 3, 256>}, {pipeline_mode = #tpu.pipeline_mode<synchronous>, transform_indices = @transform_2, window_bounds = array<i64: 64, 64>}, {pipeline_mode = #tpu.pipeline_mode<synchronous>, transform_indices = @transform_3, window_bounds = array<i64: 64, 1>}, {pipeline_mode = #tpu.pipeline_mode<synchronous>, transform_indices = @transform_4, window_bounds = array<i64: 64, 64>}, {pipeline_mode = #tpu.pipeline_mode<synchronous>, transform_indices = @transform_5, window_bounds = array<i64: 64, 1>}, {pipeline_mode = #tpu.pipeline_mode<synchronous>, transform_indices = @transform_6, window_bounds = array<i64: 3, 64>}, {pipeline_mode = #tpu.pipeline_mode<synchronous>, transform_indices = @transform_7, window_bounds = array<i64: 3, 1>}, {transform_indices = @transform_8, window_bounds = array<i64: 3, 256>}]} {
    %c0 = arith.constant 0 : index
    %c0_0 = arith.constant 0 : index
    %0 = vector.load %arg1[%c0, %c0_0] : memref<3x256xf32, #tpu.memory_space<vmem>>, vector<3x256xf32>
    %c0_1 = arith.constant 0 : index
    %c0_2 = arith.constant 0 : index
    %1 = vector.load %arg10[%c0_1, %c0_2] : memref<64x256xf32, #tpu.memory_space<vmem>>, vector<3x256xf32>
    tpu.vector_store %arg10[%c0_1, %c0_2], %0 {strides = array<i32>} : memref<64x256xf32, #tpu.memory_space<vmem>>, vector<3x256xf32>,
    %cst = arith.constant 5.000000e-01 : f32
    %2 = vector.broadcast %cst : f32 to vector<3x256xf32>
    %3 = arith.addf %0, %2 : vector<3x256xf32>
    %4 = math.floor %3 : vector<3x256xf32>
    %5 = arith.subf %0, %4 : vector<3x256xf32>
    %cst_3 = arith.constant 5.000000e-01 : f32
    %6 = vector.broadcast %cst_3 : f32 to vector<3x256xf32>
    %7 = arith.mulf %6, %4 : vector<3x256xf32>
    %8 = math.floor %7 : vector<3x256xf32>
    %cst_4 = arith.constant 2.000000e+00 : f32
    %9 = vector.broadcast %cst_4 : f32 to vector<3x256xf32>
    %10 = arith.mulf %9, %8 : vector<3x256xf32>
    %11 = arith.subf %4, %10 : vector<3x256xf32>
    %cst_5 = arith.constant 2.000000e+00 : f32
    %12 = vector.broadcast %cst_5 : f32 to vector<3x256xf32>
    %13 = arith.mulf %12, %11 : vector<3x256xf32>
    %cst_6 = arith.constant 1.000000e+00 : f32
    %14 = vector.broadcast %cst_6 : f32 to vector<3x256xf32>
    %15 = arith.subf %14, %13 : vector<3x256xf32>
    %16 = arith.mulf %5, %5 : vector<3x256xf32>
    %cst_7 = arith.constant -0.00737043098 : f32
    %17 = vector.broadcast %cst_7 : f32 to vector<3x256xf32>
    %18 = arith.mulf %17, %16 : vector<3x256xf32>
    %cst_8 = arith.constant 0.0821458846 : f32
    %19 = vector.broadcast %cst_8 : f32 to vector<3x256xf32>
    %20 = arith.addf %18, %19 : vector<3x256xf32>
    %21 = arith.mulf %20, %16 : vector<3x256xf32>
    %cst_9 = arith.constant -0.599264503 : f32
    %22 = vector.broadcast %cst_9 : f32 to vector<3x256xf32>
    %23 = arith.addf %21, %22 : vector<3x256xf32>
    %24 = arith.mulf %23, %16 : vector<3x256xf32>
    %cst_10 = arith.constant 2.55016398 : f32
    %25 = vector.broadcast %cst_10 : f32 to vector<3x256xf32>
    %26 = arith.addf %24, %25 : vector<3x256xf32>
    %27 = arith.mulf %26, %16 : vector<3x256xf32>
    %cst_11 = arith.constant -5.16771269 : f32
    %28 = vector.broadcast %cst_11 : f32 to vector<3x256xf32>
    %29 = arith.addf %27, %28 : vector<3x256xf32>
    %30 = arith.mulf %29, %16 : vector<3x256xf32>
    %cst_12 = arith.constant 3.14159274 : f32
    %31 = vector.broadcast %cst_12 : f32 to vector<3x256xf32>
    %32 = arith.addf %30, %31 : vector<3x256xf32>
    %33 = arith.mulf %32, %5 : vector<3x256xf32>
    %cst_13 = arith.constant -0.0258068908 : f32
    %34 = vector.broadcast %cst_13 : f32 to vector<3x256xf32>
    %35 = arith.mulf %34, %16 : vector<3x256xf32>
    %cst_14 = arith.constant 0.235330626 : f32
    %36 = vector.broadcast %cst_14 : f32 to vector<3x256xf32>
    %37 = arith.addf %35, %36 : vector<3x256xf32>
    %38 = arith.mulf %37, %16 : vector<3x256xf32>
    %cst_15 = arith.constant -1.33526278 : f32
    %39 = vector.broadcast %cst_15 : f32 to vector<3x256xf32>
    %40 = arith.addf %38, %39 : vector<3x256xf32>
    %41 = arith.mulf %40, %16 : vector<3x256xf32>
    %cst_16 = arith.constant 4.05871201 : f32
    %42 = vector.broadcast %cst_16 : f32 to vector<3x256xf32>
    %43 = arith.addf %41, %42 : vector<3x256xf32>
    %44 = arith.mulf %43, %16 : vector<3x256xf32>
    %cst_17 = arith.constant -4.93480206 : f32
    %45 = vector.broadcast %cst_17 : f32 to vector<3x256xf32>
    %46 = arith.addf %44, %45 : vector<3x256xf32>
    %47 = arith.mulf %46, %16 : vector<3x256xf32>
    %cst_18 = arith.constant 1.000000e+00 : f32
    %48 = vector.broadcast %cst_18 : f32 to vector<3x256xf32>
    %49 = arith.addf %47, %48 : vector<3x256xf32>
    %50 = arith.mulf %15, %33 : vector<3x256xf32>
    %51 = arith.mulf %15, %49 : vector<3x256xf32>
    %c3 = arith.constant 3 : index
    %c0_19 = arith.constant 0 : index
    %52 = vector.load %arg10[%c3, %c0_19] : memref<64x256xf32, #tpu.memory_space<vmem>>, vector<3x256xf32>
    tpu.vector_store %arg10[%c3, %c0_19], %50 {strides = array<i32>} : memref<64x256xf32, #tpu.memory_space<vmem>>, vector<3x256xf32>,
    %c6 = arith.constant 6 : index
    %c0_20 = arith.constant 0 : index
    %53 = vector.load %arg10[%c6, %c0_20] : memref<64x256xf32, #tpu.memory_space<vmem>>, vector<3x256xf32>
    tpu.vector_store %arg10[%c6, %c0_20], %51 {strides = array<i32>} : memref<64x256xf32, #tpu.memory_space<vmem>>, vector<3x256xf32>,
    %cst_21 = arith.constant 2.000000e+00 : f32
    %54 = vector.broadcast %cst_21 : f32 to vector<3x256xf32>
    %55 = arith.mulf %54, %50 : vector<3x256xf32>
    %56 = arith.mulf %55, %51 : vector<3x256xf32>
    %57 = arith.mulf %51, %51 : vector<3x256xf32>
    %58 = arith.mulf %50, %50 : vector<3x256xf32>
    %59 = arith.subf %57, %58 : vector<3x256xf32>
    %c9 = arith.constant 9 : index
    %c0_22 = arith.constant 0 : index
    %60 = vector.load %arg10[%c9, %c0_22] : memref<64x256xf32, #tpu.memory_space<vmem>>, vector<3x256xf32>
    tpu.vector_store %arg10[%c9, %c0_22], %56 {strides = array<i32>} : memref<64x256xf32, #tpu.memory_space<vmem>>, vector<3x256xf32>,
    %c12 = arith.constant 12 : index
    %c0_23 = arith.constant 0 : index
    %61 = vector.load %arg10[%c12, %c0_23] : memref<64x256xf32, #tpu.memory_space<vmem>>, vector<3x256xf32>
    tpu.vector_store %arg10[%c12, %c0_23], %59 {strides = array<i32>} : memref<64x256xf32, #tpu.memory_space<vmem>>, vector<3x256xf32>,
    %cst_24 = arith.constant 2.000000e+00 : f32
    %62 = vector.broadcast %cst_24 : f32 to vector<3x256xf32>
    %63 = arith.mulf %62, %56 : vector<3x256xf32>
    %64 = arith.mulf %63, %59 : vector<3x256xf32>
    %65 = arith.mulf %59, %59 : vector<3x256xf32>
    %66 = arith.mulf %56, %56 : vector<3x256xf32>
    %67 = arith.subf %65, %66 : vector<3x256xf32>
    %c15 = arith.constant 15 : index
    %c0_25 = arith.constant 0 : index
    %68 = vector.load %arg10[%c15, %c0_25] : memref<64x256xf32, #tpu.memory_space<vmem>>, vector<3x256xf32>
    tpu.vector_store %arg10[%c15, %c0_25], %64 {strides = array<i32>} : memref<64x256xf32, #tpu.memory_space<vmem>>, vector<3x256xf32>,
    %c18 = arith.constant 18 : index
    %c0_26 = arith.constant 0 : index
    %69 = vector.load %arg10[%c18, %c0_26] : memref<64x256xf32, #tpu.memory_space<vmem>>, vector<3x256xf32>
    tpu.vector_store %arg10[%c18, %c0_26], %67 {strides = array<i32>} : memref<64x256xf32, #tpu.memory_space<vmem>>, vector<3x256xf32>,
    %cst_27 = arith.constant 2.000000e+00 : f32
    %70 = vector.broadcast %cst_27 : f32 to vector<3x256xf32>
    %71 = arith.mulf %70, %64 : vector<3x256xf32>
    %72 = arith.mulf %71, %67 : vector<3x256xf32>
    %73 = arith.mulf %67, %67 : vector<3x256xf32>
    %74 = arith.mulf %64, %64 : vector<3x256xf32>
    %75 = arith.subf %73, %74 : vector<3x256xf32>
    %c21 = arith.constant 21 : index
    %c0_28 = arith.constant 0 : index
    %76 = vector.load %arg10[%c21, %c0_28] : memref<64x256xf32, #tpu.memory_space<vmem>>, vector<3x256xf32>
    tpu.vector_store %arg10[%c21, %c0_28], %72 {strides = array<i32>} : memref<64x256xf32, #tpu.memory_space<vmem>>, vector<3x256xf32>,
    %c24 = arith.constant 24 : index
    %c0_29 = arith.constant 0 : index
    %77 = vector.load %arg10[%c24, %c0_29] : memref<64x256xf32, #tpu.memory_space<vmem>>, vector<3x256xf32>
    tpu.vector_store %arg10[%c24, %c0_29], %75 {strides = array<i32>} : memref<64x256xf32, #tpu.memory_space<vmem>>, vector<3x256xf32>,
    %cst_30 = arith.constant 2.000000e+00 : f32
    %78 = vector.broadcast %cst_30 : f32 to vector<3x256xf32>
    %79 = arith.mulf %78, %72 : vector<3x256xf32>
    %80 = arith.mulf %79, %75 : vector<3x256xf32>
    %81 = arith.mulf %75, %75 : vector<3x256xf32>
    %82 = arith.mulf %72, %72 : vector<3x256xf32>
    %83 = arith.subf %81, %82 : vector<3x256xf32>
    %c27 = arith.constant 27 : index
    %c0_31 = arith.constant 0 : index
    %84 = vector.load %arg10[%c27, %c0_31] : memref<64x256xf32, #tpu.memory_space<vmem>>, vector<3x256xf32>
    tpu.vector_store %arg10[%c27, %c0_31], %80 {strides = array<i32>} : memref<64x256xf32, #tpu.memory_space<vmem>>, vector<3x256xf32>,
    %c30 = arith.constant 30 : index
    %c0_32 = arith.constant 0 : index
    %85 = vector.load %arg10[%c30, %c0_32] : memref<64x256xf32, #tpu.memory_space<vmem>>, vector<3x256xf32>
    tpu.vector_store %arg10[%c30, %c0_32], %83 {strides = array<i32>} : memref<64x256xf32, #tpu.memory_space<vmem>>, vector<3x256xf32>,
    %cst_33 = arith.constant 2.000000e+00 : f32
    %86 = vector.broadcast %cst_33 : f32 to vector<3x256xf32>
    %87 = arith.mulf %86, %80 : vector<3x256xf32>
    %88 = arith.mulf %87, %83 : vector<3x256xf32>
    %89 = arith.mulf %83, %83 : vector<3x256xf32>
    %90 = arith.mulf %80, %80 : vector<3x256xf32>
    %91 = arith.subf %89, %90 : vector<3x256xf32>
    %c33 = arith.constant 33 : index
    %c0_34 = arith.constant 0 : index
    %92 = vector.load %arg10[%c33, %c0_34] : memref<64x256xf32, #tpu.memory_space<vmem>>, vector<3x256xf32>
    tpu.vector_store %arg10[%c33, %c0_34], %88 {strides = array<i32>} : memref<64x256xf32, #tpu.memory_space<vmem>>, vector<3x256xf32>,
    %c36 = arith.constant 36 : index
    %c0_35 = arith.constant 0 : index
    %93 = vector.load %arg10[%c36, %c0_35] : memref<64x256xf32, #tpu.memory_space<vmem>>, vector<3x256xf32>
    tpu.vector_store %arg10[%c36, %c0_35], %91 {strides = array<i32>} : memref<64x256xf32, #tpu.memory_space<vmem>>, vector<3x256xf32>,
    %c0_36 = arith.constant 0 : index
    %c0_37 = arith.constant 0 : index
    %94 = vector.load %arg2[%c0_36, %c0_37] : memref<3x256xf32, #tpu.memory_space<vmem>>, vector<3x256xf32>
    %95 = vector.extract_strided_slice %94 {offsets = [0, 0], sizes = [1, 256], strides = [1, 1]} : vector<3x256xf32> to vector<1x256xf32>
    %96 = vector.extract_strided_slice %94 {offsets = [1, 0], sizes = [1, 256], strides = [1, 1]} : vector<3x256xf32> to vector<1x256xf32>
    %97 = vector.extract_strided_slice %94 {offsets = [2, 0], sizes = [1, 256], strides = [1, 1]} : vector<3x256xf32> to vector<1x256xf32>
    %98 = arith.mulf %95, %95 : vector<1x256xf32>
    %99 = arith.mulf %96, %96 : vector<1x256xf32>
    %100 = arith.addf %98, %99 : vector<1x256xf32>
    %101 = arith.mulf %97, %97 : vector<1x256xf32>
    %102 = arith.addf %100, %101 : vector<1x256xf32>
    %cst_38 = arith.constant 9.99999996E-13 : f32
    %103 = vector.broadcast %cst_38 : f32 to vector<1x256xf32>
    %104 = arith.addf %102, %103 : vector<1x256xf32>
    %105 = math.rsqrt %104 : vector<1x256xf32>
    %106 = arith.mulf %95, %105 : vector<1x256xf32>
    %107 = arith.mulf %96, %105 : vector<1x256xf32>
    %108 = arith.mulf %97, %105 : vector<1x256xf32>
    %109 = arith.mulf %106, %106 : vector<1x256xf32>
    %110 = arith.mulf %107, %107 : vector<1x256xf32>
    %111 = arith.mulf %108, %108 : vector<1x256xf32>
    %112 = arith.mulf %106, %107 : vector<1x256xf32>
    %113 = arith.mulf %107, %108 : vector<1x256xf32>
    %114 = arith.mulf %106, %108 : vector<1x256xf32>
    %cst_39 = arith.constant 0.282094806 : f32
    %115 = vector.broadcast %cst_39 : f32 to vector<1x256xf32>
    %cst_40 = arith.constant -0.488602519 : f32
    %116 = vector.broadcast %cst_40 : f32 to vector<1x256xf32>
    %117 = arith.mulf %116, %107 : vector<1x256xf32>
    %cst_41 = arith.constant 0.488602519 : f32
    %118 = vector.broadcast %cst_41 : f32 to vector<1x256xf32>
    %119 = arith.mulf %118, %108 : vector<1x256xf32>
    %cst_42 = arith.constant -0.488602519 : f32
    %120 = vector.broadcast %cst_42 : f32 to vector<1x256xf32>
    %121 = arith.mulf %120, %106 : vector<1x256xf32>
    %cst_43 = arith.constant 1.09254849 : f32
    %122 = vector.broadcast %cst_43 : f32 to vector<1x256xf32>
    %123 = arith.mulf %122, %112 : vector<1x256xf32>
    %cst_44 = arith.constant -1.09254849 : f32
    %124 = vector.broadcast %cst_44 : f32 to vector<1x256xf32>
    %125 = arith.mulf %124, %113 : vector<1x256xf32>
    %cst_45 = arith.constant 0.946174681 : f32
    %126 = vector.broadcast %cst_45 : f32 to vector<1x256xf32>
    %127 = arith.mulf %126, %111 : vector<1x256xf32>
    %cst_46 = arith.constant 0.31539157 : f32
    %128 = vector.broadcast %cst_46 : f32 to vector<1x256xf32>
    %129 = arith.subf %127, %128 : vector<1x256xf32>
    %cst_47 = arith.constant -1.09254849 : f32
    %130 = vector.broadcast %cst_47 : f32 to vector<1x256xf32>
    %131 = arith.mulf %130, %114 : vector<1x256xf32>
    %132 = arith.subf %109, %110 : vector<1x256xf32>
    %cst_48 = arith.constant 0.546274245 : f32
    %133 = vector.broadcast %cst_48 : f32 to vector<1x256xf32>
    %134 = arith.mulf %133, %132 : vector<1x256xf32>
    %cst_49 = arith.constant 0.590043604 : f32
    %135 = vector.broadcast %cst_49 : f32 to vector<1x256xf32>
    %136 = arith.mulf %135, %107 : vector<1x256xf32>
    %cst_50 = arith.constant -3.000000e+00 : f32
    %137 = vector.broadcast %cst_50 : f32 to vector<1x256xf32>
    %138 = arith.mulf %137, %109 : vector<1x256xf32>
    %139 = arith.addf %138, %110 : vector<1x256xf32>
    %140 = arith.mulf %136, %139 : vector<1x256xf32>
    %cst_51 = arith.constant 2.89061141 : f32
    %141 = vector.broadcast %cst_51 : f32 to vector<1x256xf32>
    %142 = arith.mulf %141, %112 : vector<1x256xf32>
    %143 = arith.mulf %142, %108 : vector<1x256xf32>
    %cst_52 = arith.constant 0.457045794 : f32
    %144 = vector.broadcast %cst_52 : f32 to vector<1x256xf32>
    %145 = arith.mulf %144, %107 : vector<1x256xf32>
    %cst_53 = arith.constant 5.000000e+00 : f32
    %146 = vector.broadcast %cst_53 : f32 to vector<1x256xf32>
    %147 = arith.mulf %146, %111 : vector<1x256xf32>
    %cst_54 = arith.constant 1.000000e+00 : f32
    %148 = vector.broadcast %cst_54 : f32 to vector<1x256xf32>
    %149 = arith.subf %148, %147 : vector<1x256xf32>
    %150 = arith.mulf %145, %149 : vector<1x256xf32>
    %cst_55 = arith.constant 0.373176336 : f32
    %151 = vector.broadcast %cst_55 : f32 to vector<1x256xf32>
    %152 = arith.mulf %151, %108 : vector<1x256xf32>
    %cst_56 = arith.constant 5.000000e+00 : f32
    %153 = vector.broadcast %cst_56 : f32 to vector<1x256xf32>
    %154 = arith.mulf %153, %111 : vector<1x256xf32>
    %cst_57 = arith.constant 3.000000e+00 : f32
    %155 = vector.broadcast %cst_57 : f32 to vector<1x256xf32>
    %156 = arith.subf %154, %155 : vector<1x256xf32>
    %157 = arith.mulf %152, %156 : vector<1x256xf32>
    %cst_58 = arith.constant 0.457045794 : f32
    %158 = vector.broadcast %cst_58 : f32 to vector<1x256xf32>
    %159 = arith.mulf %158, %106 : vector<1x256xf32>
    %cst_59 = arith.constant 5.000000e+00 : f32
    %160 = vector.broadcast %cst_59 : f32 to vector<1x256xf32>
    %161 = arith.mulf %160, %111 : vector<1x256xf32>
    %cst_60 = arith.constant 1.000000e+00 : f32
    %162 = vector.broadcast %cst_60 : f32 to vector<1x256xf32>
    %163 = arith.subf %162, %161 : vector<1x256xf32>
    %164 = arith.mulf %159, %163 : vector<1x256xf32>
    %cst_61 = arith.constant 1.44530571 : f32
    %165 = vector.broadcast %cst_61 : f32 to vector<1x256xf32>
    %166 = arith.mulf %165, %108 : vector<1x256xf32>
    %167 = arith.subf %109, %110 : vector<1x256xf32>
    %168 = arith.mulf %166, %167 : vector<1x256xf32>
    %cst_62 = arith.constant 0.590043604 : f32
    %169 = vector.broadcast %cst_62 : f32 to vector<1x256xf32>
    %170 = arith.mulf %169, %106 : vector<1x256xf32>
    %cst_63 = arith.constant 0.000000e+00 : f32
    %171 = vector.broadcast %cst_63 : f32 to vector<1x256xf32>
    %172 = arith.subf %171, %109 : vector<1x256xf32>
    %cst_64 = arith.constant 3.000000e+00 : f32
    %173 = vector.broadcast %cst_64 : f32 to vector<1x256xf32>
    %174 = arith.mulf %173, %110 : vector<1x256xf32>
    %175 = arith.addf %172, %174 : vector<1x256xf32>
    %176 = arith.mulf %170, %175 : vector<1x256xf32>
    %c39 = arith.constant 39 : index
    %c0_65 = arith.constant 0 : index
    %177 = vector.load %arg10[%c39, %c0_65] : memref<64x256xf32, #tpu.memory_space<vmem>>, vector<1x256xf32>
    tpu.vector_store %arg10[%c39, %c0_65], %115 {strides = array<i32>} : memref<64x256xf32, #tpu.memory_space<vmem>>, vector<1x256xf32>,
    %c40 = arith.constant 40 : index
    %c0_66 = arith.constant 0 : index
    %178 = vector.load %arg10[%c40, %c0_66] : memref<64x256xf32, #tpu.memory_space<vmem>>, vector<1x256xf32>
    tpu.vector_store %arg10[%c40, %c0_66], %117 {strides = array<i32>} : memref<64x256xf32, #tpu.memory_space<vmem>>, vector<1x256xf32>,
    %c41 = arith.constant 41 : index
    %c0_67 = arith.constant 0 : index
    %179 = vector.load %arg10[%c41, %c0_67] : memref<64x256xf32, #tpu.memory_space<vmem>>, vector<1x256xf32>
    tpu.vector_store %arg10[%c41, %c0_67], %119 {strides = array<i32>} : memref<64x256xf32, #tpu.memory_space<vmem>>, vector<1x256xf32>,
    %c42 = arith.constant 42 : index
    %c0_68 = arith.constant 0 : index
    %180 = vector.load %arg10[%c42, %c0_68] : memref<64x256xf32, #tpu.memory_space<vmem>>, vector<1x256xf32>
    tpu.vector_store %arg10[%c42, %c0_68], %121 {strides = array<i32>} : memref<64x256xf32, #tpu.memory_space<vmem>>, vector<1x256xf32>,
    %c43 = arith.constant 43 : index
    %c0_69 = arith.constant 0 : index
    %181 = vector.load %arg10[%c43, %c0_69] : memref<64x256xf32, #tpu.memory_space<vmem>>, vector<1x256xf32>
    tpu.vector_store %arg10[%c43, %c0_69], %123 {strides = array<i32>} : memref<64x256xf32, #tpu.memory_space<vmem>>, vector<1x256xf32>,
    %c44 = arith.constant 44 : index
    %c0_70 = arith.constant 0 : index
    %182 = vector.load %arg10[%c44, %c0_70] : memref<64x256xf32, #tpu.memory_space<vmem>>, vector<1x256xf32>
    tpu.vector_store %arg10[%c44, %c0_70], %125 {strides = array<i32>} : memref<64x256xf32, #tpu.memory_space<vmem>>, vector<1x256xf32>,
    %c45 = arith.constant 45 : index
    %c0_71 = arith.constant 0 : index
    %183 = vector.load %arg10[%c45, %c0_71] : memref<64x256xf32, #tpu.memory_space<vmem>>, vector<1x256xf32>
    tpu.vector_store %arg10[%c45, %c0_71], %129 {strides = array<i32>} : memref<64x256xf32, #tpu.memory_space<vmem>>, vector<1x256xf32>,
    %c46 = arith.constant 46 : index
    %c0_72 = arith.constant 0 : index
    %184 = vector.load %arg10[%c46, %c0_72] : memref<64x256xf32, #tpu.memory_space<vmem>>, vector<1x256xf32>
    tpu.vector_store %arg10[%c46, %c0_72], %131 {strides = array<i32>} : memref<64x256xf32, #tpu.memory_space<vmem>>, vector<1x256xf32>,
    %c47 = arith.constant 47 : index
    %c0_73 = arith.constant 0 : index
    %185 = vector.load %arg10[%c47, %c0_73] : memref<64x256xf32, #tpu.memory_space<vmem>>, vector<1x256xf32>
    tpu.vector_store %arg10[%c47, %c0_73], %134 {strides = array<i32>} : memref<64x256xf32, #tpu.memory_space<vmem>>, vector<1x256xf32>,
    %c48 = arith.constant 48 : index
    %c0_74 = arith.constant 0 : index
    %186 = vector.load %arg10[%c48, %c0_74] : memref<64x256xf32, #tpu.memory_space<vmem>>, vector<1x256xf32>
    tpu.vector_store %arg10[%c48, %c0_74], %140 {strides = array<i32>} : memref<64x256xf32, #tpu.memory_space<vmem>>, vector<1x256xf32>,
    %c49 = arith.constant 49 : index
    %c0_75 = arith.constant 0 : index
    %187 = vector.load %arg10[%c49, %c0_75] : memref<64x256xf32, #tpu.memory_space<vmem>>, vector<1x256xf32>
    tpu.vector_store %arg10[%c49, %c0_75], %143 {strides = array<i32>} : memref<64x256xf32, #tpu.memory_space<vmem>>, vector<1x256xf32>,
    %c50 = arith.constant 50 : index
    %c0_76 = arith.constant 0 : index
    %188 = vector.load %arg10[%c50, %c0_76] : memref<64x256xf32, #tpu.memory_space<vmem>>, vector<1x256xf32>
    tpu.vector_store %arg10[%c50, %c0_76], %150 {strides = array<i32>} : memref<64x256xf32, #tpu.memory_space<vmem>>, vector<1x256xf32>,
    %c51 = arith.constant 51 : index
    %c0_77 = arith.constant 0 : index
    %189 = vector.load %arg10[%c51, %c0_77] : memref<64x256xf32, #tpu.memory_space<vmem>>, vector<1x256xf32>
    tpu.vector_store %arg10[%c51, %c0_77], %157 {strides = array<i32>} : memref<64x256xf32, #tpu.memory_space<vmem>>, vector<1x256xf32>,
    %c52 = arith.constant 52 : index
    %c0_78 = arith.constant 0 : index
    %190 = vector.load %arg10[%c52, %c0_78] : memref<64x256xf32, #tpu.memory_space<vmem>>, vector<1x256xf32>
    tpu.vector_store %arg10[%c52, %c0_78], %164 {strides = array<i32>} : memref<64x256xf32, #tpu.memory_space<vmem>>, vector<1x256xf32>,
    %c53 = arith.constant 53 : index
    %c0_79 = arith.constant 0 : index
    %191 = vector.load %arg10[%c53, %c0_79] : memref<64x256xf32, #tpu.memory_space<vmem>>, vector<1x256xf32>
    tpu.vector_store %arg10[%c53, %c0_79], %168 {strides = array<i32>} : memref<64x256xf32, #tpu.memory_space<vmem>>, vector<1x256xf32>,
    %c54 = arith.constant 54 : index
    %c0_80 = arith.constant 0 : index
    %192 = vector.load %arg10[%c54, %c0_80] : memref<64x256xf32, #tpu.memory_space<vmem>>, vector<1x256xf32>
    tpu.vector_store %arg10[%c54, %c0_80], %176 {strides = array<i32>} : memref<64x256xf32, #tpu.memory_space<vmem>>, vector<1x256xf32>,
    %cst_81 = arith.constant 0.000000e+00 : f32
    %193 = vector.broadcast %cst_81 : f32 to vector<9x256xf32>
    %c55 = arith.constant 55 : index
    %c0_82 = arith.constant 0 : index
    %194 = vector.load %arg10[%c55, %c0_82] : memref<64x256xf32, #tpu.memory_space<vmem>>, vector<9x256xf32>
    tpu.vector_store %arg10[%c55, %c0_82], %193 {strides = array<i32>} : memref<64x256xf32, #tpu.memory_space<vmem>>, vector<9x256xf32>,
    %c0_83 = arith.constant 0 : index
    %c0_84 = arith.constant 0 : index
    %195 = vector.load %arg10[%c0_83, %c0_84] : memref<64x256xf32, #tpu.memory_space<vmem>>, vector<64x256xf32>
    %c0_85 = arith.constant 0 : index
    %c0_86 = arith.constant 0 : index
    %196 = vector.load %arg3[%c0_85, %c0_86] : memref<64x64xf32, #tpu.memory_space<vmem>>, vector<64x64xf32>
    %c0_87 = arith.constant 0 : index
    %c0_88 = arith.constant 0 : index
    %197 = vector.load %arg4[%c0_87, %c0_88] : memref<64x1xf32, #tpu.memory_space<vmem>>, vector<64x1xf32>
    %cst_89 = arith.constant dense<0.000000e+00> : vector<64x256xf32>
    %198 = tpu.matmul %196, %195, %cst_89 {dimension_numbers = #tpu.dot_dimension_numbers<[1], [0], [0], [1], [0, 0, 1, 1], [], []>} : vector<64x64xf32>, vector<64x256xf32>, vector<64x256xf32> -> vector<64x256xf32>
    %199 = vector.broadcast %197 : vector<64x1xf32> to vector<64x256xf32>
    %200 = arith.addf %198, %199 : vector<64x256xf32>
    %cst_90 = arith.constant 0.000000e+00 : f32
    %201 = vector.broadcast %cst_90 : f32 to vector<64x256xf32>
    %202 = arith.maximumf %200, %201 : vector<64x256xf32>
    %c0_91 = arith.constant 0 : index
    %c0_92 = arith.constant 0 : index
    %203 = vector.load %arg5[%c0_91, %c0_92] : memref<64x64xf32, #tpu.memory_space<vmem>>, vector<64x64xf32>
    %c0_93 = arith.constant 0 : index
    %c0_94 = arith.constant 0 : index
    %204 = vector.load %arg6[%c0_93, %c0_94] : memref<64x1xf32, #tpu.memory_space<vmem>>, vector<64x1xf32>
    %cst_95 = arith.constant dense<0.000000e+00> : vector<64x256xf32>
    %205 = tpu.matmul %203, %202, %cst_95 {dimension_numbers = #tpu.dot_dimension_numbers<[1], [0], [0], [1], [0, 0, 1, 1], [], []>} : vector<64x64xf32>, vector<64x256xf32>, vector<64x256xf32> -> vector<64x256xf32>
    %206 = vector.broadcast %204 : vector<64x1xf32> to vector<64x256xf32>
    %207 = arith.addf %205, %206 : vector<64x256xf32>
    %cst_96 = arith.constant 0.000000e+00 : f32
    %208 = vector.broadcast %cst_96 : f32 to vector<64x256xf32>
    %209 = arith.maximumf %207, %208 : vector<64x256xf32>
    %c0_97 = arith.constant 0 : index
    %c0_98 = arith.constant 0 : index
    %210 = vector.load %arg7[%c0_97, %c0_98] : memref<3x64xf32, #tpu.memory_space<vmem>>, vector<3x64xf32>
    %c0_99 = arith.constant 0 : index
    %c0_100 = arith.constant 0 : index
    %211 = vector.load %arg8[%c0_99, %c0_100] : memref<3x1xf32, #tpu.memory_space<vmem>>, vector<3x1xf32>
    %cst_101 = arith.constant dense<0.000000e+00> : vector<3x256xf32>
    %212 = tpu.matmul %210, %209, %cst_101 {dimension_numbers = #tpu.dot_dimension_numbers<[1], [0], [0], [1], [0, 0, 1, 1], [], []>} : vector<3x64xf32>, vector<64x256xf32>, vector<3x256xf32> -> vector<3x256xf32>
    %213 = vector.broadcast %211 : vector<3x1xf32> to vector<3x256xf32>
    %214 = arith.addf %212, %213 : vector<3x256xf32>
    %215 = arith.negf %214 : vector<3x256xf32>
    %216 = math.exp %215 : vector<3x256xf32>
    %cst_102 = arith.constant 1.000000e+00 : f32
    %217 = vector.broadcast %cst_102 : f32 to vector<3x256xf32>
    %218 = arith.addf %217, %216 : vector<3x256xf32>
    %219 = arith.divf %217, %218 : vector<3x256xf32>
    %c0_103 = arith.constant 0 : index
    %c0_104 = arith.constant 0 : index
    %220 = vector.load %arg9[%c0_103, %c0_104] : memref<3x256xf32, #tpu.memory_space<vmem>>, vector<3x256xf32>
    tpu.vector_store %arg9[%c0_103, %c0_104], %219 {strides = array<i32>} : memref<3x256xf32, #tpu.memory_space<vmem>>, vector<3x256xf32>,
    return
  }
  func.func @transform_0(%arg0: i32) -> (i32, i32) {
    %c0_i32 = arith.constant 0 : i32
    %c0_i32_0 = arith.constant 0 : i32
    return %c0_i32, %arg0 : i32, i32
  }
  func.func @transform_1(%arg0: i32) -> (i32, i32) {
    %c0_i32 = arith.constant 0 : i32
    %c0_i32_0 = arith.constant 0 : i32
    return %c0_i32, %arg0 : i32, i32
  }
  func.func @transform_2(%arg0: i32) -> (i32, i32) {
    %c0_i32 = arith.constant 0 : i32
    %c0_i32_0 = arith.constant 0 : i32
    %c0_i32_1 = arith.constant 0 : i32
    return %c0_i32, %c0_i32_0 : i32, i32
  }
  func.func @transform_3(%arg0: i32) -> (i32, i32) {
    %c0_i32 = arith.constant 0 : i32
    %c0_i32_0 = arith.constant 0 : i32
    %c0_i32_1 = arith.constant 0 : i32
    return %c0_i32, %c0_i32_0 : i32, i32
  }
  func.func @transform_4(%arg0: i32) -> (i32, i32) {
    %c0_i32 = arith.constant 0 : i32
    %c0_i32_0 = arith.constant 0 : i32
    %c0_i32_1 = arith.constant 0 : i32
    return %c0_i32, %c0_i32_0 : i32, i32
  }
  func.func @transform_5(%arg0: i32) -> (i32, i32) {
    %c0_i32 = arith.constant 0 : i32
    %c0_i32_0 = arith.constant 0 : i32
    %c0_i32_1 = arith.constant 0 : i32
    return %c0_i32, %c0_i32_0 : i32, i32
  }
  func.func @transform_6(%arg0: i32) -> (i32, i32) {
    %c0_i32 = arith.constant 0 : i32
    %c0_i32_0 = arith.constant 0 : i32
    %c0_i32_1 = arith.constant 0 : i32
    return %c0_i32, %c0_i32_0 : i32, i32
  }
  func.func @transform_7(%arg0: i32) -> (i32, i32) {
    %c0_i32 = arith.constant 0 : i32
    %c0_i32_0 = arith.constant 0 : i32
    %c0_i32_1 = arith.constant 0 : i32
    return %c0_i32, %c0_i32_0 : i32, i32
  }
  func.func @transform_8(%arg0: i32) -> (i32, i32) {
    %c0_i32 = arith.constant 0 : i32
    %c0_i32_0 = arith.constant 0 : i32
    return %c0_i32, %arg0 : i32, i32
  }
}

</mosaic_0001>

<bundles_post_ra>
// kernel: tpu_custom_call.1
= control target key start
LH: loop header
LB: loop body
LE: loop exit
PB: predicated region body
PF: predicated region fallthrough
CT: control target
= control target key end

     0   :  { %13 = vsyncpa [#allocation4], 0  ;;  %s2431_s0 = inlined_call_operand.hbm [shape: f32[3,320], index: 0, kind: input, shape index: {}]   ;;  %s2432_s1 = inlined_call_operand.hbm [shape: f32[3,320], index: 1, kind: input, shape index: {}]   ;;  %s2433_s2 = inlined_call_operand.vmem [shape: f32[64,64], index: 2, kind: input, shape index: {}]   ;;  %s2434_s3 = inlined_call_operand.vmem [shape: f32[64,1], index: 3, kind: input, shape index: {}]   ;;  %s2435_s4 = inlined_call_operand.vmem [shape: f32[64,64], index: 4, kind: input, shape index: {}]   ;;  %s2436_s5 = inlined_call_operand.vmem [shape: f32[64,1], index: 5, kind: input, shape index: {}]   ;;  %s2437_s6 = inlined_call_operand.vmem [shape: f32[3,64], index: 6, kind: input, shape index: {}]   ;;  %s2438_s7 = inlined_call_operand.vmem [shape: f32[3,1], index: 7, kind: input, shape index: {}]   ;;  %s2439_s8 = inlined_call_operand.hbm [shape: f32[3,320], index: 8, kind: output, shape index: {}]  }
   0x1   :  { %15 = vsyncpa [#allocation4 + $0x1], 0 }
   0x2   :  { %16 = vsyncpa [#allocation7], 0 }
   0x3   :  { %18 = vsyncpa [#allocation7 + $0x1], 0 }
   0x4   :  { %19 = vsyncpa [#allocation5], 0 }
   0x5   :  { %21 = vsyncpa [#allocation5 + $0x1], 0  ;;  %s1932_s27 = smov 0   ;;  %s1934_s28 = smov 0  }
   0x6   :  { %s1936_s29 = smov 0   ;;  %s1938_s30 = smov 0  }
   0x7 LB: > { %s1953_s9 = sadd.s32 4294967295, %s1878_s30   ;;  %s1586_s10 = sadd.s32 4294967294, %s1878_s30   ;;  %s1878_s30 = sphi %s1938_s30, %s2461_s30   ;;  %s1874_s29 = sphi %s1936_s29, %s2465_s29   ;;  %s1870_s28 = sphi %s1934_s28, %s2464_s28   ;;  %s1866_s27 = sphi %s1932_s27, %s2463_s27  }
   0x8   : > { %s1957_s11 = sadd.s32 1, %s1878_s30   ;;  %s34_s12 = sadd.s32 1, %s1874_s29 }
   0x9   : > { %2446 = sst [smem:[#allocation12_spill]] %s1957_s11  ;;  %s31_s13 = ssub.s32 %s1878_s30, %s1957_s11 }
   0xa   : > { %p41_p0 = scmp.ne.s32.totalorder %s1874_s29, %s1870_s28  ;;  %p32_p1 = scmp.eq.s32.totalorder %s31_s13, 0 }
   0xb   : > { %p42_p2 = scmp.eq.s32.totalorder %s1878_s30, 0  ;;  %p47_p3 = scmp.ne.s32.totalorder %s1870_s28, %s1866_s27 }
   0xc   : > { %p48_p4 = scmp.eq.s32.totalorder %s1953_s9, 0  ;;  %p223_p7 = scmp.eq.s32.totalorder %s1953_s9, 1 }
   0xd   : > { %s1969_s14 = scalar_select %p32_p1, %s1874_s29, %s34_s12  }
   0xe   : > { %p1971_p5 = por %p42_p2, %p41_p0  ;;  %p1975_p6 = por %p48_p4, %p47_p3 }
   0xf   : > { %2447 = sst [smem:[#allocation13_spill]] %s1969_s14  ;;  %p229_p8 = scmp.eq.s32.totalorder %s1586_s10, 1 }
  0x10   : > { %s2448_s15 = scalar_select %p1971_p5, 1, 0 }
  0x11   : > { %s2449_s16 = scalar_select %p1975_p6, 1, 0 }
  0x12   : > { %p1980_p9 = por %p223_p7, %p41_p0  ;;  %p1984_p10 = por %p229_p8, %p47_p3 }
  0x13   : > { %p2443_p11 = scmp.ge.s32.totalorder %s1878_s30, 2 }
  0x14   : > { %s2450_s17 = scalar_select %p1980_p9, 1, 0 }
  0x15   : > { %s2451_s18 = scalar_select %p1984_p10, 1, 0 }
  0x16   : > { %263 = sbr.rel (%p2443_p11) target bundleno = 99 (0x63), region = 40 }
  0x17   : > { %2452 = sst [smem:[#allocation14_spill]] %s2451_s18 }
  0x1d   : > { %266 = sbr.rel (!%p1971_p5) target bundleno = 63 (0x3f), region = 44  ;;  %s267_s19 = sand.u32 (%p1971_p5), 1, %s1874_s29  }
  0x1e   : > { %s1590_s20 = sshll.u32 (%p1971_p5), %s1878_s30, 1  ;;  %s1589_s21 = sshll.u32 (%p1971_p5), %s267_s19, 3 }
  0x1f   : > { %s273_s22 = ssub.s32 (%p1971_p5), 3, %s1590_s20  ;;  %s1998_s25 = scalar_lea.sflag (%p1971_p5), [#allocation4], %s267_s19 }
  0x20   : > { %p274_p12 = scmp.lt.s32.totalorder (%p1971_p5), %s273_s22, 2  ;;  %s271_s26 = scalar_lea.vmem (%p1971_p5), [#allocation3], %s1589_s21 }
  0x24   : > { %s2467_s22 = smov (!%p274_p12, %s273_s22), 2 }
  0x25   : > { %s1995_s23 = sshll.u32 %s2467_s22, 6 }
  0x26   : > { %s278_s24 = ssub.s32 128, %s1995_s23 }
  0x27   : > { %279 = vsyncadd %s1998_s25, %s278_s24  ;;  %p1592_p13 = scmp.ne.s32.totalorder %s1995_s23, 0  ;;  %s1644_s10 = sshll.u32 %s1878_s30, 7 }
  0x28   : > { %s2006_s20 = scalar_lea.hbm %s2431_s0, %s1644_s10  ;;  %s285_s19 = sshll.u32 %s271_s26, 4  ;;  %s286_s19 = int_to_ptr.vmem [resolvable:$true] %s285_s19 }
  0x29   : > { %s1752_s22 = scalar_lea.hbm %s2006_s20, %s1995_s23  ;;  %s1756_s14 = scalar_lea.hbm %s2431_s0, 192 }
  0x2a   : > { %p1753_p0 = scmp.ne.s32.totalorder %s2006_s20, %s1752_s22  ;;  %p1757_p3 = scmp.lt.u32.totalorder %s2006_s20, %s2431_s0 }
  0x2b   : > { %p1758_p4 = scmp.lt.u32.totalorder %s1756_s14, %s1752_s22  ;;  %p1760_p8 = scmp.lt.u32.totalorder %s1752_s22, %s2006_s20 }
  0x2c   : > { %p1754_p1 = pnand %p1753_p0, %p1592_p13 }
  0x2d   : > { %p1759_p7 = por %p1758_p4, %p1757_p3 }
  0x2e   : > { %p1755_p2 = pneg %p1754_p1 }
  0x2f   : > { %p1761_p12 = por %p1760_p8, %p1759_p7 }
  0x31   : > { %p1762_p11 = pnand %p1761_p12, %p1755_p2 }
  0x33   : > { %1765 = shalt.err (!%p1762_p11)
}
  0x34   : > { %s1766_s26 = scalar_lea.vmem %s286_s19, %s1995_s23  ;;  %s1880_s10 = smov [#allocation3]  }
  0x35   : > { %p1767_p10 = scmp.ne.s32.totalorder %s286_s19, %s1766_s26  ;;  %s1770_s12 = sshll.u32 %s1880_s10, 4  ;;  %s1771_s12 = int_to_ptr.vmem [resolvable:$false] %s1770_s12 }
  0x36   : > { %s1772_s13 = scalar_lea.vmem %s1771_s12, 256  ;;  %p1773_p9 = scmp.lt.s32.totalorder %s286_s19, %s1771_s12 }
  0x37   : > { %p1768_p0 = pnand %p1767_p10, %p1592_p13  ;;  %p1774_p6 = scmp.lt.s32.totalorder %s1772_s13, %s1766_s26 }
  0x39   : > { %p1769_p1 = pneg %p1768_p0  ;;  %p1775_p5 = por %p1774_p6, %p1773_p9 }
  0x3b   : > { %p1776_p3 = pnand %p1775_p5, %p1769_p1 }
  0x3d   : > { %1779 = shalt.err (!%p1776_p3)
}
  0x3e   : > { %288 = dma.hbm_to_vmem [thread:$0]  (%p1592_p13), %s2006_s20, %s1995_s23, %s286_s19, %s1998_s25  }
  0x3f PF: > { %p2453_p11 = scmp.ne.s32.totalorder %s2448_s15, 0 }
  0x40   : > { %s292_s11 = sand.u32 (%p2453_p11), 1, %s1874_s29   ;;  %s1597_s14 = sshll.u32 (%p2453_p11), %s1878_s30, 1 }
  0x41   : > { %291 = sbr.rel (!%p2453_p11) target bundleno = 99 (0x63), region = 48  ;;  %s1596_s18 = sshll.u32 (%p2453_p11), %s292_s11, 3 }
  0x42   : > { %s298_s22 = ssub.s32 (%p2453_p11), 3, %s1597_s14  ;;  %s2036_s26 = scalar_lea.sflag (%p2453_p11), [#allocation7], %s292_s11 }
  0x43   : > { %p299_p10 = scmp.lt.s32.totalorder (%p2453_p11), %s298_s22, 2  ;;  %s296_s23 = scalar_lea.vmem (%p2453_p11), [#allocation6], %s1596_s18 }
  0x48   : > { %s2469_s22 = smov (!%p299_p10, %s298_s22), 2 }
  0x49   : > { %s2033_s21 = sshll.u32 %s2469_s22, 6 }
  0x4a   : > { %s303_s24 = ssub.s32 128, %s2033_s21 }
  0x4b   : > { %304 = vsyncadd %s2036_s26, %s303_s24  ;;  %p1599_p5 = scmp.ne.s32.totalorder %s2033_s21, 0  ;;  %s1645_s15 = sshll.u32 %s1878_s30, 7 }
  0x4c   : > { %s2044_s19 = scalar_lea.hbm %s2432_s1, %s1645_s15  ;;  %s310_s10 = sshll.u32 %s296_s23, 4  ;;  %s311_s10 = int_to_ptr.vmem [resolvable:$true] %s310_s10 }
  0x4d   : > { %s1780_s12 = scalar_lea.hbm %s2044_s19, %s2033_s21  ;;  %s1784_s14 = scalar_lea.hbm %s2432_s1, 192 }
  0x4e   : > { %p1781_p6 = scmp.ne.s32.totalorder %s2044_s19, %s1780_s12  ;;  %p1785_p2 = scmp.lt.u32.totalorder %s2044_s19, %s2432_s1 }
  0x4f   : > { %p1786_p4 = scmp.lt.u32.totalorder %s1784_s14, %s1780_s12  ;;  %p1788_p8 = scmp.lt.u32.totalorder %s1780_s12, %s2044_s19 }
  0x50   : > { %p1782_p9 = pnand %p1781_p6, %p1599_p5 }
  0x51   : > { %p1787_p7 = por %p1786_p4, %p1785_p2 }
  0x52   : > { %p1783_p13 = pneg %p1782_p9 }
  0x53   : > { %p1789_p12 = por %p1788_p8, %p1787_p7 }
  0x55   : > { %p1790_p0 = pnand %p1789_p12, %p1783_p13 }
  0x57   : > { %1793 = shalt.err (!%p1790_p0)
}
  0x58   : > { %s1794_s24 = scalar_lea.vmem %s311_s10, %s2033_s21  ;;  %s1881_s23 = smov [#allocation6]  }
  0x59   : > { %p1795_p1 = scmp.ne.s32.totalorder %s311_s10, %s1794_s24  ;;  %s1798_s15 = sshll.u32 %s1881_s23, 4  ;;  %s1799_s15 = int_to_ptr.vmem [resolvable:$false] %s1798_s15 }
  0x5a   : > { %s1800_s25 = scalar_lea.vmem %s1799_s15, 256  ;;  %p1801_p10 = scmp.lt.s32.totalorder %s311_s10, %s1799_s15 }
  0x5b   : > { %p1796_p3 = pnand %p1795_p1, %p1599_p5  ;;  %p1802_p6 = scmp.lt.s32.totalorder %s1800_s25, %s1794_s24 }
  0x5d   : > { %p1797_p11 = pneg %p1796_p3  ;;  %p1803_p9 = por %p1802_p6, %p1801_p10 }
  0x5f   : > { %p1804_p2 = pnand %p1803_p9, %p1797_p11 }
  0x61   : > { %1807 = shalt.err (!%p1804_p2)
}
  0x62   : > { %313 = dma.hbm_to_vmem [thread:$0]  (%p1599_p5), %s2044_s19, %s2033_s21, %s311_s10, %s2036_s26  }
  0x63 PF: > { %p1603_p13 = scmp.ge.s32.totalorder %s1878_s30, 1  ;;  %p315_p4 = scmp.lt.s32.totalorder %s1878_s30, 3 }
  0x65   : > { %p316_p7 = pnand %p1603_p13, %p315_p4 }
  0x66   : > { %s2070_s20 = sand.u32 (!%p316_p7), 1, %s1870_s28   ;;  %p2454_p5 = scmp.ne.s32.totalorder (!%p316_p7), %s2449_s16, 0 }
  0x67   : > { %319 = sbr.rel (%p316_p7) target bundleno = 971 (0x3cb), region = 52  ;;  %s2073_s12 = sshll.u32 (!%p316_p7), %s2070_s20, 3 }
  0x68   : > { %s322_s13 = scalar_lea.sflag (!%p316_p7), [#allocation4], %s2070_s20  ;;  %s325_s11 = scalar_lea.vmem (!%p316_p7), [#allocation3], %s2073_s12 }
  0x6e   : > { %1853 = dma.done.wait (%p2454_p5), %s322_s13, 128  }
  0x6f   : > { %1855 = vsyncadd (%p2454_p5), %s322_s13, 4294967168  ;;  %s331_s21 = scalar_lea.sflag [#allocation7], %s2070_s20  ;;  %s334_s26 = scalar_lea.vmem [#allocation6], %s2073_s12 }
  0x70   : > { %1857 = dma.done.wait (%p2454_p5), %s331_s21, 128  }
  0x71   : > { %1859 = vsyncadd (%p2454_p5), %s331_s21, 4294967168  ;;  %v635_v0 = vlaneseq  ;;  %v1882_v1 = vmov 0.0   ;;  %v1883_v3 = vmov 0   ;;  %v1884_v4 = vmov 0.2820948   ;;  %v963_v13 = vld [vmem:[%s2434_s3] sm:$0xff] }
  0x72   : > { %936 = vst [vmem:[#allocation2 + $0x68] sm:$0x80] %v1882_v1  ;;  %935 = vst [vmem:[#allocation2 + $0x60] sm:$0x80] %v1882_v1  ;;  %1100 = vmatprep.mubr.f32.mxu0 %v1882_v1  ;;  %1309 = vmatprep.mubr.f32.mxu1 %v1882_v1  ;;  %v387_v5 = vld [vmem:[%s325_s11] sm:$0x77] }
  0x73   : > { %vm2092_vm0 = vcmp.lt.s32.totalorder %v635_v0, 256  ;;  %1739 = vset.pattern.permute.xlu0 %v1883_v3  ;;  %1740 = vset.pattern.permute.xlu1 %v1883_v3  ;;  %v2098_v6 = vld [vmem:[%s334_s26] sm:$0x77]  ;;  %v389_v7 = vcombine.high %v387_v5, %v387_v5  ;;  %v393_v8 = vadd.f32 0.5, %v387_v5  ;;  %391 = vst [vmem:[#allocation2] sm:$0x7] %v387_v5 }
  0x74   : > { %640 = vst.msk [vmem:[#allocation2 + $0x47] ss:$8 sm:$0x3] %vm2092_vm0, %v1884_v4  ;;  %v545_v9 = vmul.f32 %v2098_v6, %v2098_v6  ;;  %973 = vperm.xlu0 %1739, %v963_v13   ;;  %v965_v14 = vld [vmem:[%s2434_s3 + $0x10] sm:$0xff]  ;;  %v964_v18 = vld [vmem:[%s2434_s3 + $0x8] sm:$0xff]  ;;  %v966_v19 = vld [vmem:[%s2434_s3 + $0x18] sm:$0xff] }
  0x75   : > { %392 = vst [vmem:[#allocation2 + $0x8] sm:$0x7] %v389_v7  ;;  %v394_v10 = vfloor.f32 %v393_v8  ;;  %983 = vperm.xlu1 %1740, %v965_v14   ;;  %v967_v25 = vld [vmem:[%s2434_s3 + $0x20] sm:$0xff]  ;;  %v968_v27 = vld [vmem:[%s2434_s3 + $0x28] sm:$0xff]  ;;  %v969_v33 = vld [vmem:[%s2434_s3 + $0x30] sm:$0xff]  ;;  %v647_v47 = vshrl.u32 %v635_v0, 7 }
  0x76   : > { %v1607_v11 = vrot.slane %v545_v9, 9  ;;  %v1608_v12 = vrot.slane %v545_v9, 10  ;;  %v970_v34 = vld [vmem:[%s2434_s3 + $0x38] sm:$0xff]  ;;  %v1885_v37 = vmov 1966171168   ;;  %v1173_v42 = vld [vmem:[%s2436_s5] sm:$0xff] }
  0x77   : > { %v2108_v15 = vsub.f32 %v387_v5, %v394_v10  ;;  %v396_v16 = vmul.f32 0.5, %v394_v10  ;;  %v644_v38 = vunpack.c.l.s4 %v1885_v37  ;;  %v1174_v43 = vld [vmem:[%s2436_s5 + $0x8] sm:$0xff]  ;;  %v1175_v51 = vld [vmem:[%s2436_s5 + $0x10] sm:$0xff]  ;;  %v1176_v53 = vld [vmem:[%s2436_s5 + $0x18] sm:$0xff]  ;;  %vm1011_vm1 = vcmask 523264   ;;  %s371_s21 = scalar_lea.vmem [#allocation8], %s2073_s12 }
  0x78   : > { %v550_v17 = vadd.f32 %v1607_v11, %v545_v9  ;;  %978 = vperm.xlu0 %1739, %v964_v18   ;;  %v1177_v0 = vld [vmem:[%s2436_s5 + $0x20] sm:$0xff]  ;;  %v1178_v8 = vld [vmem:[%s2436_s5 + $0x28] sm:$0xff]  ;;  %s1473_s26 = scalar_lea.sflag [#allocation5], %s2070_s20  ;;  %p2457_p8 = scmp.ne.s32.totalorder %s2450_s17, 0 }
  0x79   : > { %v402_v20 = vmul.f32 %v2108_v15, %v2108_v15  ;;  %v397_v22 = vfloor.f32 %v396_v16  ;;  %988 = vperm.xlu1 %1740, %v966_v19   ;;  %v645_v46 = vunpack.c.0.s8 %v644_v38  ;;  %v1375_v38 = vld [vmem:[%s2438_s7] sm:$0x7]  ;;  %v956_v2 = vld [vmem:[%s2433_s2 + $0x8] sm:$0xff]  ;;  %s1636_s16 = sshll.u32 (%p2457_p8), %s1953_s9, 1 }
  0x7a   : > { %v554_v21 = vadd.f32 %v1608_v12, %v550_v17  ;;  %s1481_s19 = ssub.s32 (%p2457_p8), 3, %s1636_s16 }
  0x7b   : > { %v403_v23 = vmul.f32 -0.007370431, %v402_v20  ;;  %v414_v24 = vmul.f32 -0.02580689, %v402_v20  ;;  %v398_v30 = vmul.f32 2.0, %v397_v22  ;;  %v2146_v59 = vsub.s32 %v645_v46, %v647_v47  ;;  %p1482_p12 = scmp.lt.s32.totalorder (%p2457_p8), %s1481_s19, 2 }
  0x7c   : > { %v555_v26 = vadd.f32 1e-12, %v554_v21  ;;  %993 = vperm.xlu0 %1739, %v967_v25   ;;  %v1179_v21 = vld [vmem:[%s2436_s5 + $0x30] sm:$0xff] }
  0x7d   : > { %v404_v28 = vadd.f32 0.082145885, %v403_v23  ;;  %v415_v29 = vadd.f32 0.23533063, %v414_v24  ;;  %998 = vperm.xlu1 %1740, %v968_v27   ;;  %v399_v39 = vsub.f32 %v394_v10, %v398_v30 }
  0x7e   : > { %1742 = vrsqrt.f32 %v555_v26 }
  0x7f   : > { %v405_v31 = vmul.f32 %v404_v28, %v402_v20  ;;  %v416_v32 = vmul.f32 %v415_v29, %v402_v20  ;;  %v400_v48 = vmul.f32 2.0, %v399_v39 }
  0x80   : > { %1003 = vperm.xlu0 %1739, %v969_v33  }
  0x81   : > { %v406_v35 = vadd.f32 -0.5992645, %v405_v31  ;;  %v417_v36 = vadd.f32 -1.3352628, %v416_v32  ;;  %1008 = vperm.xlu1 %1740, %v970_v34   ;;  %v401_v60 = vsub.f32 1.0, %v400_v48 }
  0x83   : > { %v407_v40 = vmul.f32 %v406_v35, %v402_v20  ;;  %v418_v41 = vmul.f32 %v417_v36, %v402_v20 }
  0x84   : > { %1183 = vperm.xlu0 %1739, %v1173_v42  }
  0x85   : > { %v408_v44 = vadd.f32 2.550164, %v407_v40  ;;  %v419_v45 = vadd.f32 4.058712, %v418_v41  ;;  %1188 = vperm.xlu1 %1740, %v1174_v43  }
  0x87   : > { %v409_v49 = vmul.f32 %v408_v44, %v402_v20  ;;  %v420_v50 = vmul.f32 %v419_v45, %v402_v20 }
  0x88   : > { %v1743_v52 = vpop.eup %1742  ;;  %1193 = vperm.xlu0 %1739, %v1175_v51  }
  0x89   : > { %v410_v54 = vadd.f32 -5.1677127, %v409_v49  ;;  %v421_v55 = vadd.f32 -4.934802, %v420_v50  ;;  %v2144_v56 = vmul.f32 %v1743_v52, %v2098_v6  ;;  %v559_v57 = vrot.slane %v1743_v52, 7  ;;  %1198 = vperm.xlu1 %1740, %v1176_v53  }
  0x8a   : > { %v562_v58 = vrot.slane %v1743_v52, 6 }
  0x8b   : > { %v411_v61 = vmul.f32 %v410_v54, %v402_v20  ;;  %v422_v62 = vmul.f32 %v421_v55, %v402_v20  ;;  %v2149_v63 = vmul.f32 %v559_v57, %v2098_v6  ;;  %v2159_v4 = vmul.f32 %v2144_v56, %v2144_v56 }
  0x8c   : > { %v2155_v3 = vmul.f32 %v562_v58, %v2098_v6  ;;  %v2162_v5 = vmul.f32 -0.48860252, %v2144_v56  ;;  %v2165_v7 = vmul.f32 0.4570458, %v2144_v56  ;;  %1203 = vperm.xlu0 %1739, %v1177_v0  }
  0x8d   : > { %v412_v9 = vadd.f32 3.1415927, %v411_v61  ;;  %v423_v10 = vadd.f32 1.0, %v422_v62  ;;  %v2172_v6 = vmul.f32 %v2149_v63, %v2149_v63  ;;  %v1609_v11 = vrot.slane %v2149_v63, 9  ;;  %1208 = vperm.xlu1 %1740, %v1178_v8  }
  0x8e   : > { %v2177_v12 = vmul.f32 %v2155_v3, %v2155_v3  ;;  %v1610_v13 = vrot.slane %v2155_v3, 9  ;;  %v578_v14 = vrot.slane %v2155_v3, 6  ;;  %v582_v16 = vmul.f32 -0.48860252, %v2149_v63 }
  0x8f   : > { %v413_v17 = vmul.f32 %v412_v9, %v2108_v15  ;;  %v425_v18 = vmul.f32 %v423_v10, %v401_v60  ;;  %v2184_v19 = vmul.f32 %v1609_v11, %v2144_v56  ;;  %v583_v20 = vmul.f32 0.48860252, %v2155_v3  ;;  %v1180_v15 = vld [vmem:[%s2436_s5 + $0x38] sm:$0xff] }
  0x90   : > { %v577_v22 = vmul.f32 %v1610_v13, %v2149_v63  ;;  %v2191_v23 = vrot.slane %v578_v14, 4  ;;  %v587_v24 = vmul.f32 0.9461747, %v2177_v12  ;;  %v591_v25 = vrot.slane %v2172_v6, 5  ;;  %1213 = vperm.xlu0 %1739, %v1179_v21  }
  0x91   : > { %v424_v26 = vmul.f32 %v413_v17, %v401_v60  ;;  %v435_v27 = vcombine.high %v425_v18, %v425_v18  ;;  %v446_v28 = vmul.f32 %v425_v18, %v425_v18  ;;  %v436_v29 = vrot.slane %v425_v18, 2  ;;  %1218 = vperm.xlu1 %1740, %v1180_v15  }
  0x92   : > { %v581_v30 = vmul.f32 %v2191_v23, %v2144_v56  ;;  %v585_v31 = vmul.f32 1.0925485, %v2184_v19  ;;  %v586_v32 = vmul.f32 -1.0925485, %v577_v22  ;;  %v1611_v33 = vadd.f32 -0.31539157, %v587_v24 }
  0x93   : > { %v427_v34 = vcombine.high %v424_v26, %v424_v26  ;;  %v437_v35 = vrot.slane %v435_v27, 2  ;;  %v444_v36 = vmul.f32 2.0, %v424_v26  ;;  %v447_v37 = vmul.f32 %v424_v26, %v424_v26  ;;  %440 = vst [vmem:[#allocation2 + $0x10] ss:$-12 sps:$4 sm:$0xc1] %v436_v29  }
  0x94   : > { %v428_v39 = vrot.slane %v424_v26, 5  ;;  %v2204_v40 = vmul.f32 -1.0925485, %v581_v30  ;;  %v2206_v41 = vrot.slane %v591_v25, 4  ;;  %v649_v42 = vrot.slane %v582_v16, %v2146_v59  ;;  %1378 = vperm.xlu0 %1739, %v1375_v38  }
  0x95   : > { %v429_v43 = vrot.slane %v427_v34, 5  ;;  %441 = vst [vmem:[#allocation2 + $0x18] ss:$-12 sps:$4 sm:$0xc1] %v437_v35   ;;  %v445_v44 = vmul.f32 %v444_v36, %v425_v18  ;;  %v448_v45 = vsub.f32 %v446_v28, %v447_v37  ;;  %v669_v46 = vrot.slane %v583_v20, %v2146_v59 }
  0x96   : > { %432 = vst [vmem:[#allocation2] sm:$0x38] %v428_v39  ;;  %v2212_v47 = vsub.f32 %v2159_v4, %v2206_v41  ;;  %v650_v48 = vcombine.high %v649_v42, %v649_v42  ;;  %v689_v49 = vrot.slane %v2162_v5, %v2146_v59  ;;  %v708_v50 = vrot.slane %v585_v31, %v2146_v59 }
  0x97   : > { %433 = vst [vmem:[#allocation2 + $0x8] sm:$0x38] %v429_v43  ;;  %v450_v51 = vcombine.high %v445_v44, %v445_v44  ;;  %461 = vst [vmem:[#allocation2 + $0x18] sm:$0x70] %v448_v45  ;;  %v462_v52 = vmul.f32 2.0, %v445_v44  ;;  %v464_v53 = vmul.f32 %v448_v45, %v448_v45  ;;  %v451_v54 = vrot.slane %v445_v44, 7 }
  0x98   : > { %v458_v55 = vcombine.low %v448_v45, %v448_v45  ;;  %v465_v57 = vmul.f32 %v445_v44, %v445_v44  ;;  %v595_v58 = vmul.f32 0.54627424, %v2212_v47  ;;  %v657_v60 = vrot.slane %v650_v48, %v2146_v59 }
  0x99   : > { %v452_v61 = vrot.slane %v450_v51, 7  ;;  %v463_v62 = vmul.f32 %v462_v52, %v448_v45  ;;  %455 = vst [vmem:[#allocation2 + $0x10] sm:$0xe] %v451_v54  ;;  %v676_v0 = vrot.slane %v669_v46, %v2146_v59  ;;  %v696_v5 = vrot.slane %v689_v49, %v2146_v59 }
  0x9a   : > { %460 = vst [vmem:[#allocation2 + $0x10] sm:$0x70] %v458_v55  ;;  %v466_v8 = vsub.f32 %v464_v53, %v465_v57  ;;  %660 = vst.msk [vmem:[#allocation2 + $0x50] ss:$8 sm:$0x3] %vm2092_vm0, %v657_v60  ;;  %v715_v9 = vrot.slane %v708_v50, %v2146_v59  ;;  %v727_v10 = vrot.slane %v586_v32, %v2146_v59  ;;  %v597_v48 = vmul.f32 -3.0, %v2159_v4 }
  0x9b   : > { %v747_v11 = vrot.slane %v1611_v33, %v2146_v59  ;;  %456 = vst [vmem:[#allocation2 + $0x18] sm:$0xe] %v452_v61  ;;  %v468_v13 = vcombine.high %v463_v62, %v463_v62  ;;  %v469_v14 = vrot.slane %v463_v62, 1  ;;  %v485_v16 = vmul.f32 2.0, %v463_v62 }
  0x9c   : > { %v488_v17 = vmul.f32 %v463_v62, %v463_v62  ;;  %699 = vst.msk [vmem:[#allocation2 + $0x52] ss:$8 sm:$0x3] %vm2092_vm0, %v696_v5  ;;  %v478_v18 = vcombine.high %v466_v8, %v466_v8  ;;  %v487_v20 = vmul.f32 %v466_v8, %v466_v8  ;;  %v479_v21 = vrot.slane %v466_v8, 6 }
  0x9d   : > { %v677_v22 = vcombine.high %v676_v0, %v676_v0  ;;  %718 = vst.msk [vmem:[#allocation2 + $0x53] ss:$8 sm:$0x3] %vm2092_vm0, %v715_v9  ;;  %v470_v24 = vrot.slane %v468_v13, 1  ;;  %v486_v25 = vmul.f32 %v485_v16, %v466_v8  ;;  %v728_v15 = vcombine.high %v727_v10, %v727_v10  ;;  %v939_v44 = vld [vmem:[#allocation2] sm:$0xff] }
  0x9e   : > { %473 = vst [vmem:[#allocation2 + $0x20] ss:$-12 sps:$4 sm:$0x83] %v469_v14   ;;  %v754_v26 = vrot.slane %v747_v11, %v2146_v59  ;;  %v480_v27 = vrot.slane %v478_v18, 6  ;;  %v489_v28 = vsub.f32 %v487_v20, %v488_v17  ;;  %483 = vst [vmem:[#allocation2 + $0x20] sm:$0x1c] %v479_v21  ;;  %v767_v29 = vrot.slane %v2204_v40, %v2146_v59 }
  0x9f   : > { %680 = vst.msk [vmem:[#allocation2 + $0x51] ss:$8 sm:$0x3] %vm2092_vm0, %v677_v22  ;;  %v786_v30 = vrot.slane %v595_v58, %v2146_v59  ;;  %474 = vst [vmem:[#allocation2 + $0x28] ss:$-12 sps:$4 sm:$0x83] %v470_v24   ;;  %v491_v31 = vcombine.high %v486_v25, %v486_v25  ;;  %v506_v33 = vmul.f32 %v486_v25, %v486_v25 }
  0xa0   : > { %v503_v32 = vmul.f32 2.0, %v486_v25  ;;  %v492_v34 = vrot.slane %v486_v25, 3  ;;  %484 = vst [vmem:[#allocation2 + $0x28] sm:$0x1c] %v480_v27  ;;  %v499_v35 = vcombine.high %v489_v28, %v489_v28  ;;  %v505_v36 = vmul.f32 %v489_v28, %v489_v28  ;;  %501 = vst [vmem:[#allocation2 + $0x30] sm:$0x7] %v489_v28 }
  0xa1   : > { %v735_v37 = vrot.slane %v728_v15, %v2146_v59  ;;  %v755_v38 = vcombine.high %v754_v26, %v754_v26  ;;  %v493_v39 = vrot.slane %v491_v31, 3  ;;  %v774_v43 = vrot.slane %v767_v29, %v2146_v59  ;;  %v940_v54 = vld [vmem:[#allocation2 + $0x8] sm:$0xff] }
  0xa2   : > { %v504_v42 = vmul.f32 %v503_v32, %v489_v28  ;;  %496 = vst [vmem:[#allocation2 + $0x20] sm:$0xe0] %v492_v34  ;;  %v793_v40 = vrot.slane %v786_v30, %v2146_v59  ;;  %502 = vst [vmem:[#allocation2 + $0x38] sm:$0x7] %v499_v35  ;;  %v507_v45 = vsub.f32 %v505_v36, %v506_v33  ;;  %v596_v46 = vmul.f32 0.5900436, %v2149_v63 }
  0xa3   : > { %738 = vst.msk [vmem:[#allocation2 + $0x54] ss:$8 sm:$0x3] %vm2092_vm0, %v735_v37  ;;  %758 = vst.msk [vmem:[#allocation2 + $0x55] ss:$8 sm:$0x3] %vm2092_vm0, %v755_v38  ;;  %v598_v61 = vadd.f32 %v597_v48, %v2206_v41 }
  0xa4   : > { %v603_v49 = vmul.f32 2.8906114, %v2184_v19  ;;  %497 = vst [vmem:[#allocation2 + $0x28] sm:$0xe0] %v493_v39  ;;  %v509_v50 = vcombine.high %v504_v42, %v504_v42  ;;  %v510_v51 = vrot.slane %v504_v42, 5  ;;  %v526_v52 = vmul.f32 2.0, %v504_v42 }
  0xa5   : > { %v529_v53 = vmul.f32 %v504_v42, %v504_v42  ;;  %777 = vst.msk [vmem:[#allocation2 + $0x56] ss:$8 sm:$0x3] %vm2092_vm0, %v774_v43  ;;  %796 = vst.msk [vmem:[#allocation2 + $0x57] ss:$8 sm:$0x3] %vm2092_vm0, %v793_v40  ;;  %v517_v57 = vcombine.high %v507_v45, %v507_v45  ;;  %v528_v60 = vmul.f32 %v507_v45, %v507_v45 }
  0xa6   : > { %v941_v55 = vld [vmem:[#allocation2 + $0x10] sm:$0xff]  ;;  %v518_v58 = vrot.slane %v507_v45, 2  ;;  %v511_v19 = vrot.slane %v509_v50, 5  ;;  %514 = vst [vmem:[#allocation2 + $0x30] sm:$0x38] %v510_v51  ;;  %v527_v0 = vmul.f32 %v526_v52, %v507_v45  ;;  %v604_v5 = vmul.f32 %v603_v49, %v2191_v23  ;;  %v942_v8 = vld [vmem:[#allocation2 + $0x18] sm:$0xff] }
  0xa7   : > { %v1649_v62 = vpack.c.bf16 %v941_v55, %v939_v44  ;;  %v519_v9 = vrot.slane %v517_v57, 2  ;;  %v530_v10 = vsub.f32 %v528_v60, %v529_v53  ;;  %v600_v11 = vrot.slane %v598_v61, 7 }
  0xa8   : > { %522 = vst [vmem:[#allocation2 + $0x40] ss:$-12 sps:$4 sm:$0xc1] %v518_v58   ;;  %v605_v13 = vmul.f32 0.4570458, %v2149_v63  ;;  %v1647_v14 = vpack.c.bf16 %v942_v8, %v940_v54  ;;  %v532_v16 = vcombine.high %v527_v0, %v527_v0  ;;  %v533_v17 = vrot.slane %v527_v0, 7 }
  0xa9   : > { %515 = vst [vmem:[#allocation2 + $0x38] sm:$0x38] %v511_v19  ;;  %v606_v18 = vmul.f32 5.0, %v2177_v12  ;;  %523 = vst [vmem:[#allocation2 + $0x48] ss:$-12 sps:$4 sm:$0xc1] %v519_v9   ;;  %v540_v41 = vcombine.low %v530_v10, %v530_v10  ;;  %v602_v20 = vmul.f32 %v600_v11, %v596_v46  ;;  %v825_v27 = vrot.slane %v604_v5, %v2146_v59 }
  0xaa   : > { %543 = vst [vmem:[#allocation2 + $0x48] sm:$0x70] %v530_v10  ;;  %v613_v21 = vmul.f32 0.37317634, %v2155_v3  ;;  %v621_v23 = vmul.f32 1.4453057, %v2155_v3  ;;  %1648 = vmatprep.subr.bf16.mxu0 %v1647_v14 }
  0xab   : > { %v534_v22 = vrot.slane %v532_v16, 7  ;;  %537 = vst [vmem:[#allocation2 + $0x40] sm:$0xe] %v533_v17  ;;  %v607_v24 = vsub.f32 1.0, %v606_v18  ;;  %v1613_v25 = vadd.f32 -3.0, %v606_v18  ;;  %v623_v63 = vrot.slane %v2212_v47, 6  ;;  %1650 = vmatpush1.bf16.msra.mxu0 %v1649_v62 }
  0xac   : > { %542 = vst [vmem:[#allocation2 + $0x40] sm:$0x70] %v540_v41  ;;  %v627_v15 = vsub.f32 0.0, %v2159_v4  ;;  %v628_v12 = vmul.f32 3.0, %v2172_v6  ;;  %v805_v26 = vrot.slane %v602_v20, %v2146_v59  ;;  %v943_v28 = vld [vmem:[#allocation2 + $0x20] sm:$0xff]  ;;  %v832_v34 = vrot.slane %v825_v27, %v2146_v59  ;;  %v944_v35 = vld [vmem:[#allocation2 + $0x28] sm:$0xff] }
  0xad   : > { %538 = vst [vmem:[#allocation2 + $0x48] sm:$0xe] %v534_v22  ;;  %v1612_v3 = vrot.slane %v607_v24, 9  ;;  %v615_v29 = vmul.f32 %v1613_v25, %v613_v21  ;;  %v1614_v30 = vrot.slane %v607_v24, 10  ;;  %v625_v31 = vmul.f32 %v623_v63, %v621_v23  ;;  %v950_v48 = vld [vmem:[#allocation2 + $0x58] sm:$0xff]  ;;  %v949_v49 = vld [vmem:[#allocation2 + $0x50] sm:$0xff] }
  0xae   : > { %v626_v32 = vmul.f32 0.5900436, %v2144_v56  ;;  %v1615_v33 = vrot.slane %v628_v12, 9  ;;  %v806_v47 = vcombine.high %v805_v26, %v805_v26  ;;  %835 = vst.msk [vmem:[#allocation2 + $0x61] ss:$8 sm:$0x3] %vm2092_vm0, %v832_v34 }
  0xaf   : > { %v945_v4 = vld [vmem:[#allocation2 + $0x30] sm:$0xff]  ;;  %v612_v36 = vmul.f32 %v1612_v3, %v605_v13  ;;  %v620_v6 = vmul.f32 %v1614_v30, %v2165_v7  ;;  %v864_v37 = vrot.slane %v615_v29, %v2146_v59  ;;  %v903_v38 = vrot.slane %v625_v31, %v2146_v59  ;;  %v958_v11 = vld [vmem:[%s2433_s2 + $0x18] sm:$0xff]  ;;  %v959_v13 = vld [vmem:[%s2433_s2 + $0x20] sm:$0xff] }
  0xb0   : > { %v1653_v39 = vpack.c.bf16 %v945_v4, %v943_v28  ;;  %v633_v42 = vadd.f32 %v1615_v33, %v627_v15  ;;  %v813_v43 = vrot.slane %v806_v47, %v2146_v59  ;;  %v946_v56 = vld [vmem:[#allocation2 + $0x38] sm:$0xff]  ;;  %v957_v10 = vld [vmem:[%s2433_s2 + $0x10] sm:$0xff]  ;;  %v960_v14 = vld [vmem:[%s2433_s2 + $0x28] sm:$0xff] }
  0xb1   : > { %v844_v40 = vrot.slane %v612_v36, %v2146_v59  ;;  %v871_v44 = vrot.slane %v864_v37, %v2146_v59  ;;  %v884_v45 = vrot.slane %v620_v6, %v2146_v59  ;;  %v910_v7 = vrot.slane %v903_v38, %v2146_v59  ;;  %v961_v16 = vld [vmem:[%s2433_s2 + $0x30] sm:$0xff]  ;;  %v962_v17 = vld [vmem:[%s2433_s2 + $0x38] sm:$0xff] }
  0xb2   : > { %v1651_v46 = vpack.c.bf16 %v946_v56, %v944_v35  ;;  %v634_v50 = vmul.f32 %v633_v42, %v626_v32  ;;  %816 = vst.msk [vmem:[#allocation2 + $0x60] ss:$8 sm:$0x3] %vm2092_vm0, %v813_v43 }
  0xb3   : > { %v947_v51 = vld [vmem:[#allocation2 + $0x40] sm:$0xff]  ;;  %v845_v52 = vcombine.high %v844_v40, %v844_v40  ;;  %v872_v53 = vcombine.high %v871_v44, %v871_v44  ;;  %v891_v54 = vrot.slane %v884_v45, %v2146_v59  ;;  %v911_v55 = vcombine.high %v910_v7, %v910_v7 }
  0xb4   : > { %1652 = vmatprep.subr.bf16.mxu0 %v1651_v46  ;;  %v948_v57 = vld [vmem:[#allocation2 + $0x48] sm:$0xff]  ;;  %v923_v58 = vrot.slane %v634_v50, %v2146_v59  ;;  %v1657_v61 = vpack.c.bf16 %v949_v49, %v947_v51 }
  0xb5   : > { %1654 = vmatpush1.bf16.msra.mxu0 %v1653_v39  ;;  %v1655_v60 = vpack.c.bf16 %v950_v48, %v948_v57  ;;  %v852_v62 = vrot.slane %v845_v52, %v2146_v59  ;;  %875 = vst.msk [vmem:[#allocation2 + $0x63] ss:$8 sm:$0x3] %vm2092_vm0, %v872_v53  ;;  %894 = vst.msk [vmem:[#allocation2 + $0x64] ss:$8 sm:$0x3] %vm2092_vm0, %v891_v54 }
  0xb6   : > { %914 = vst.msk [vmem:[#allocation2 + $0x65] ss:$8 sm:$0x3] %vm2092_vm0, %v911_v55  ;;  %v930_v19 = vrot.slane %v923_v58, %v2146_v59  ;;  %v955_v59 = vld [vmem:[%s2433_s2] sm:$0xff] }
  0xb7   : > { %1656 = vmatprep.subr.bf16.mxu0 %v1655_v60  ;;  %855 = vst.msk [vmem:[#allocation2 + $0x62] ss:$8 sm:$0x3] %vm2092_vm0, %v852_v62 }
  0xb8   : > { %933 = vst.msk [vmem:[#allocation2 + $0x66] ss:$8 sm:$0x3] %vm2092_vm0, %v930_v19 }
  0xb9   : > { %1658 = vmatpush1.bf16.msra.mxu0 %v1657_v61 }
  0xbf   : > { %v952_v0 = vld [vmem:[#allocation2 + $0x68] sm:$0xff]  ;;  %v951_v5 = vld [vmem:[#allocation2 + $0x60] sm:$0xff] }
  0xc0   : > { %v1659_v8 = vpack.c.bf16 %v1882_v1, %v952_v0  ;;  %v1661_v9 = vpack.c.bf16 %v1882_v1, %v951_v5 }
  0xc2   : > { %1660 = vmatprep.subr.bf16.mxu0 %v1659_v8 }
  0xc3   : > { %1662 = vmatpush1.bf16.msra.mxu0 %v1661_v9 }
  0xc6   : > { %1616 = vmatmul.mubr.msk.f32.vlgmr.msra.gmra.mrb[0].mxu0 %vm1011_vm1, %v955_v59 }
  0xc7   : > { %1106 = vmatprep.mubr.f32.mxu0 %v1882_v1 }
  0xca   : > { %1617 = vmatmul.mubr.msk.f32.gmra.mrb[2].mxu0 %vm1011_vm1, %v956_v2 }
  0xcb   : > { %1112 = vmatprep.mubr.f32.mxu0 %v1882_v1 }
  0xce   : > { %1618 = vmatmul.mubr.msk.f32.gmra.mrb[4].mxu0 %vm1011_vm1, %v957_v10 }
  0xcf   : > { %1118 = vmatprep.mubr.f32.mxu0 %v1882_v1 }
  0xd2   : > { %1619 = vmatmul.mubr.msk.f32.gmra.mrb[6].mxu0 %vm1011_vm1, %v958_v11 }
  0xd3   : > { %1124 = vmatprep.mubr.f32.mxu0 %v1882_v1 }
  0xd6   : > { %1620 = vmatmul.mubr.msk.f32.gmra.mrb[8].mxu0 %vm1011_vm1, %v959_v13 }
  0xd7   : > { %1130 = vmatprep.mubr.f32.mxu0 %v1882_v1 }
  0xda   : > { %1621 = vmatmul.mubr.msk.f32.gmra.mrb[10].mxu0 %vm1011_vm1, %v960_v14 }
  0xdb   : > { %1136 = vmatprep.mubr.f32.mxu0 %v1882_v1 }
  0xde   : > { %1622 = vmatmul.mubr.msk.f32.gmra.mrb[12].mxu0 %vm1011_vm1, %v961_v16 }
  0xdf   : > { %1142 = vmatprep.mubr.f32.mxu0 %v1882_v1 }
  0xe2   : > { %1623 = vmatmul.mubr.msk.f32.gmra.mrb[14].mxu0 %vm1011_vm1, %v962_v17 }
  0xe3   : > { %1448 = vmatprep.mubr.f32.mxu0 %v1882_v1 }
  0xf3   : > { %v974_v18 = vpop.permute.xlu0 %973 }
  0xf4   : > { %v984_v15 = vpop.permute.xlu1 %983 }
  0xf7   : > { %v979_v23 = vpop.permute.xlu0 %978 }
  0xf8   : > { %v989_v47 = vpop.permute.xlu1 %988 }
  0xfb   : > { %v994_v44 = vpop.permute.xlu0 %993 }
  0xfc   : > { %v999_v46 = vpop.permute.xlu1 %998 }
  0xff   : > { %v1004_v62 = vpop.permute.xlu0 %1003 }
 0x100   : > { %v1009_v5 = vpop.permute.xlu1 %1008 }
 0x199   : > { %v1102_v41 = vpop.f32.mrb[0].mxu0 }
 0x19a   : > { %v1104_v20 = vpop.f32.mrb[1].mxu0  ;;  %v1103_v21 = vadd.f32 %v1102_v41, %v974_v18  ;;  %v1165_v41 = vld [vmem:[%s2435_s4] sm:$0xff] }
 0x19b   : > { %v1105_v22 = vadd.f32 %v1104_v20, %v974_v18  ;;  %v1166_v20 = vld [vmem:[%s2435_s4 + $0x8] sm:$0xff] }
 0x19c   : > { %v1149_v26 = vmax.f32 %v1103_v21, 0.0  ;;  %v1167_v21 = vld [vmem:[%s2435_s4 + $0x10] sm:$0xff] }
 0x19d   : > { %v1108_v24 = vpop.f32.mrb[2].mxu0  ;;  %v1150_v28 = vmax.f32 %v1105_v22, 0.0  ;;  %v1169_v22 = vld [vmem:[%s2435_s4 + $0x20] sm:$0xff] }
 0x19e   : > { %v1109_v25 = vadd.f32 %v1108_v24, %v979_v23  ;;  %v1110_v63 = vpop.f32.mrb[3].mxu0  ;;  %v1170_v24 = vld [vmem:[%s2435_s4 + $0x28] sm:$0xff] }
 0x19f   : > { %v1111_v12 = vadd.f32 %v1110_v63, %v979_v23  ;;  %v1168_v23 = vld [vmem:[%s2435_s4 + $0x18] sm:$0xff] }
 0x1a0   : > { %v1151_v27 = vmax.f32 %v1109_v25, 0.0  ;;  %v1171_v25 = vld [vmem:[%s2435_s4 + $0x30] sm:$0xff]  ;;  %v1172_v63 = vld [vmem:[%s2435_s4 + $0x38] sm:$0xff] }
 0x1a1   : > { %v1152_v3 = vmax.f32 %v1111_v12, 0.0  ;;  %v1114_v29 = vpop.f32.mrb[4].mxu0 }
 0x1a2   : > { %v1116_v30 = vpop.f32.mrb[5].mxu0  ;;  %v1665_v31 = vpack.c.bf16 %v1151_v27, %v1149_v26  ;;  %v1115_v33 = vadd.f32 %v1114_v29, %v984_v15  ;;  %v1184_v26 = vpop.permute.xlu0 %1183 }
 0x1a3   : > { %v1663_v32 = vpack.c.bf16 %v1152_v3, %v1150_v28  ;;  %v1117_v34 = vadd.f32 %v1116_v30, %v984_v15  ;;  %v1189_v28 = vpop.permute.xlu1 %1188 }
 0x1a4   : > { %v1153_v37 = vmax.f32 %v1115_v33, 0.0 }
 0x1a5   : > { %v1120_v35 = vpop.f32.mrb[6].mxu0  ;;  %1664 = vmatprep.subr.bf16.mxu1 %v1663_v32  ;;  %v1154_v39 = vmax.f32 %v1117_v34, 0.0 }
 0x1a6   : > { %v1121_v4 = vadd.f32 %v1120_v35, %v989_v47  ;;  %v1122_v36 = vpop.f32.mrb[7].mxu0  ;;  %1666 = vmatpush1.bf16.msra.mxu1 %v1665_v31 }
 0x1a7   : > { %v1123_v6 = vadd.f32 %v1122_v36, %v989_v47 }
 0x1a8   : > { %v1155_v38 = vmax.f32 %v1121_v4, 0.0 }
 0x1a9   : > { %v1156_v42 = vmax.f32 %v1123_v6, 0.0  ;;  %v1126_v43 = vpop.f32.mrb[8].mxu0  ;;  %v1194_v6 = vpop.permute.xlu0 %1193 }
 0x1aa   : > { %v1669_v56 = vpack.c.bf16 %v1155_v38, %v1153_v37  ;;  %v1128_v40 = vpop.f32.mrb[9].mxu0  ;;  %v1127_v7 = vadd.f32 %v1126_v43, %v994_v44 }
 0x1ab   : > { %v1667_v45 = vpack.c.bf16 %v1156_v42, %v1154_v39  ;;  %v1129_v48 = vadd.f32 %v1128_v40, %v994_v44  ;;  %v1199_v39 = vpop.permute.xlu1 %1198 }
 0x1ac   : > { %v1157_v53 = vmax.f32 %v1127_v7, 0.0 }
 0x1ad   : > { %v1132_v49 = vpop.f32.mrb[10].mxu0  ;;  %1668 = vmatprep.subr.bf16.mxu1 %v1667_v45  ;;  %v1158_v55 = vmax.f32 %v1129_v48, 0.0 }
 0x1ae   : > { %v1133_v50 = vadd.f32 %v1132_v49, %v999_v46  ;;  %v1134_v51 = vpop.f32.mrb[11].mxu0  ;;  %1670 = vmatpush1.bf16.msra.mxu1 %v1669_v56 }
 0x1af   : > { %v1135_v52 = vadd.f32 %v1134_v51, %v999_v46 }
 0x1b0   : > { %v1159_v54 = vmax.f32 %v1133_v50, 0.0 }
 0x1b1   : > { %v1160_v57 = vmax.f32 %v1135_v52, 0.0  ;;  %v1138_v58 = vpop.f32.mrb[12].mxu0  ;;  %v1204_v52 = vpop.permute.xlu0 %1203 }
 0x1b2   : > { %v1673_v60 = vpack.c.bf16 %v1159_v54, %v1157_v53  ;;  %v1140_v61 = vpop.f32.mrb[13].mxu0  ;;  %v1139_v0 = vadd.f32 %v1138_v58, %v1004_v62 }
 0x1b3   : > { %v1671_v19 = vpack.c.bf16 %v1160_v57, %v1158_v55  ;;  %v1141_v8 = vadd.f32 %v1140_v61, %v1004_v62  ;;  %v1209_v55 = vpop.permute.xlu1 %1208 }
 0x1b4   : > { %v1161_v11 = vmax.f32 %v1139_v0, 0.0 }
 0x1b5   : > { %v1144_v9 = vpop.f32.mrb[14].mxu0  ;;  %1672 = vmatprep.subr.bf16.mxu1 %v1671_v19  ;;  %v1162_v14 = vmax.f32 %v1141_v8, 0.0 }
 0x1b6   : > { %v1145_v59 = vadd.f32 %v1144_v9, %v1009_v5  ;;  %v1146_v2 = vpop.f32.mrb[15].mxu0  ;;  %1674 = vmatpush1.bf16.msra.mxu1 %v1673_v60 }
 0x1b7   : > { %v1147_v10 = vadd.f32 %v1146_v2, %v1009_v5 }
 0x1b8   : > { %v1163_v13 = vmax.f32 %v1145_v59, 0.0 }
 0x1b9   : > { %v1164_v16 = vmax.f32 %v1147_v10, 0.0  ;;  %v1214_v10 = vpop.permute.xlu0 %1213 }
 0x1ba   : > { %v1677_v17 = vpack.c.bf16 %v1163_v13, %v1161_v11 }
 0x1bb   : > { %v1675_v18 = vpack.c.bf16 %v1164_v16, %v1162_v14  ;;  %v1219_v14 = vpop.permute.xlu1 %1218 }
 0x1bd   : > { %1676 = vmatprep.subr.bf16.mxu1 %v1675_v18 }
 0x1be   : > { %1678 = vmatpush1.bf16.msra.mxu1 %v1677_v17 }
 0x1c1   : > { %1624 = vmatmul.mubr.msk.f32.vlgmr.msra.gmra.mrb[0].mxu1 %vm1011_vm1, %v1165_v41 }
 0x1c2   : > { %1315 = vmatprep.mubr.f32.mxu1 %v1882_v1 }
 0x1c5   : > { %1625 = vmatmul.mubr.msk.f32.gmra.mrb[2].mxu1 %vm1011_vm1, %v1166_v20 }
 0x1c6   : > { %1321 = vmatprep.mubr.f32.mxu1 %v1882_v1 }
 0x1c9   : > { %1626 = vmatmul.mubr.msk.f32.gmra.mrb[4].mxu1 %vm1011_vm1, %v1167_v21 }
 0x1ca   : > { %1327 = vmatprep.mubr.f32.mxu1 %v1882_v1 }
 0x1cd   : > { %1627 = vmatmul.mubr.msk.f32.gmra.mrb[6].mxu1 %vm1011_vm1, %v1168_v23 }
 0x1ce   : > { %1333 = vmatprep.mubr.f32.mxu1 %v1882_v1 }
 0x1d1   : > { %1628 = vmatmul.mubr.msk.f32.gmra.mrb[8].mxu1 %vm1011_vm1, %v1169_v22 }
 0x1d2   : > { %1339 = vmatprep.mubr.f32.mxu1 %v1882_v1 }
 0x1d5   : > { %1629 = vmatmul.mubr.msk.f32.gmra.mrb[10].mxu1 %vm1011_vm1, %v1170_v24 }
 0x1d6   : > { %1345 = vmatprep.mubr.f32.mxu1 %v1882_v1 }
 0x1d9   : > { %1630 = vmatmul.mubr.msk.f32.gmra.mrb[12].mxu1 %vm1011_vm1, %v1171_v25 }
 0x1da   : > { %1351 = vmatprep.mubr.f32.mxu1 %v1882_v1 }
 0x1dd   : > { %1631 = vmatmul.mubr.msk.f32.gmra.mrb[14].mxu1 %vm1011_vm1, %v1172_v63 }
 0x294   : > { %v1311_v15 = vpop.f32.mrb[0].mxu1 }
 0x295   : > { %v1313_v12 = vpop.f32.mrb[1].mxu1  ;;  %v1312_v27 = vadd.f32 %v1311_v15, %v1184_v26  ;;  %v1374_v15 = vld [vmem:[%s2437_s6] sm:$0x7] }
 0x296   : > { %v1314_v3 = vadd.f32 %v1313_v12, %v1184_v26  ;;  %v1379_v12 = vpop.permute.xlu0 %1378 }
 0x297   : > { %v1358_v33 = vmax.f32 %v1312_v27, 0.0 }
 0x298   : > { %v1317_v29 = vpop.f32.mrb[2].mxu1  ;;  %v1359_v34 = vmax.f32 %v1314_v3, 0.0 }
 0x299   : > { %v1318_v30 = vadd.f32 %v1317_v29, %v1189_v28  ;;  %v1319_v31 = vpop.f32.mrb[3].mxu1 }
 0x29a   : > { %v1320_v32 = vadd.f32 %v1319_v31, %v1189_v28 }
 0x29b   : > { %v1360_v47 = vmax.f32 %v1318_v30, 0.0 }
 0x29c   : > { %v1361_v1 = vmax.f32 %v1320_v32, 0.0  ;;  %v1323_v35 = vpop.f32.mrb[4].mxu1 }
 0x29d   : > { %v1681_v4 = vpack.c.bf16 %v1360_v47, %v1358_v33  ;;  %v1325_v36 = vpop.f32.mrb[5].mxu1  ;;  %v1324_v38 = vadd.f32 %v1323_v35, %v1194_v6 }
 0x29e   : > { %v1679_v37 = vpack.c.bf16 %v1361_v1, %v1359_v34  ;;  %v1326_v42 = vadd.f32 %v1325_v36, %v1194_v6 }
 0x29f   : > { %v1362_v45 = vmax.f32 %v1324_v38, 0.0 }
 0x2a0   : > { %v1329_v43 = vpop.f32.mrb[6].mxu1  ;;  %1680 = vmatprep.subr.bf16.mxu0 %v1679_v37  ;;  %v1363_v46 = vmax.f32 %v1326_v42, 0.0 }
 0x2a1   : > { %v1330_v56 = vadd.f32 %v1329_v43, %v1199_v39  ;;  %v1331_v40 = vpop.f32.mrb[7].mxu1  ;;  %1682 = vmatpush1.bf16.msra.mxu0 %v1681_v4 }
 0x2a2   : > { %v1332_v44 = vadd.f32 %v1331_v40, %v1199_v39 }
 0x2a3   : > { %v1364_v7 = vmax.f32 %v1330_v56, 0.0 }
 0x2a4   : > { %v1365_v48 = vmax.f32 %v1332_v44, 0.0  ;;  %v1335_v49 = vpop.f32.mrb[8].mxu1 }
 0x2a5   : > { %v1685_v50 = vpack.c.bf16 %v1364_v7, %v1362_v45  ;;  %v1337_v51 = vpop.f32.mrb[9].mxu1  ;;  %v1336_v54 = vadd.f32 %v1335_v49, %v1204_v52 }
 0x2a6   : > { %v1683_v53 = vpack.c.bf16 %v1365_v48, %v1363_v46  ;;  %v1338_v57 = vadd.f32 %v1337_v51, %v1204_v52 }
 0x2a7   : > { %v1366_v19 = vmax.f32 %v1336_v54, 0.0 }
 0x2a8   : > { %v1341_v58 = vpop.f32.mrb[10].mxu1  ;;  %1684 = vmatprep.subr.bf16.mxu0 %v1683_v53  ;;  %v1367_v5 = vmax.f32 %v1338_v57, 0.0 }
 0x2a9   : > { %v1342_v60 = vadd.f32 %v1341_v58, %v1209_v55  ;;  %v1343_v61 = vpop.f32.mrb[11].mxu1  ;;  %1686 = vmatpush1.bf16.msra.mxu0 %v1685_v50 }
 0x2aa   : > { %v1344_v62 = vadd.f32 %v1343_v61, %v1209_v55 }
 0x2ab   : > { %v1368_v0 = vmax.f32 %v1342_v60, 0.0 }
 0x2ac   : > { %v1369_v8 = vmax.f32 %v1344_v62, 0.0  ;;  %v1347_v9 = vpop.f32.mrb[12].mxu1 }
 0x2ad   : > { %v1689_v59 = vpack.c.bf16 %v1368_v0, %v1366_v19  ;;  %v1349_v2 = vpop.f32.mrb[13].mxu1  ;;  %v1348_v13 = vadd.f32 %v1347_v9, %v1214_v10 }
 0x2ae   : > { %v1687_v11 = vpack.c.bf16 %v1369_v8, %v1367_v5  ;;  %v1350_v16 = vadd.f32 %v1349_v2, %v1214_v10 }
 0x2af   : > { %v1370_v21 = vmax.f32 %v1348_v13, 0.0 }
 0x2b0   : > { %v1353_v17 = vpop.f32.mrb[14].mxu1  ;;  %1688 = vmatprep.subr.bf16.mxu0 %v1687_v11  ;;  %v1371_v22 = vmax.f32 %v1350_v16, 0.0 }
 0x2b1   : > { %v1354_v18 = vadd.f32 %v1353_v17, %v1219_v14  ;;  %v1355_v41 = vpop.f32.mrb[15].mxu1  ;;  %1690 = vmatpush1.bf16.msra.mxu0 %v1689_v59 }
 0x2b2   : > { %v1356_v20 = vadd.f32 %v1355_v41, %v1219_v14 }
 0x2b3   : > { %v1372_v23 = vmax.f32 %v1354_v18, 0.0 }
 0x2b4   : > { %v1373_v24 = vmax.f32 %v1356_v20, 0.0 }
 0x2b5   : > { %v1693_v25 = vpack.c.bf16 %v1372_v23, %v1370_v21 }
 0x2b6   : > { %v1691_v63 = vpack.c.bf16 %v1373_v24, %v1371_v22 }
 0x2b8   : > { %1692 = vmatprep.subr.bf16.mxu0 %v1691_v63 }
 0x2b9   : > { %1694 = vmatpush1.bf16.msra.mxu0 %v1693_v25 }
 0x2bc   : > { %1632 = vmatmul.mubr.msk.f32.vlgmr.msra.gmra.mrb[16].mxu0 %vm1011_vm1, %v1374_v15 }
 0x38f   : > { %v1450_v26 = vpop.f32.mrb[16].mxu0 }
 0x390   : > { %v1451_v27 = vadd.f32 %v1450_v26, %v1379_v12  ;;  %v1452_v28 = vpop.f32.mrb[17].mxu0 }
 0x391   : > { %v1453_v3 = vadd.f32 %v1452_v28, %v1379_v12 }
 0x392   : > { %v1633_v29 = vmul.f32 -1.442695, %v1451_v27 }
 0x393   : > { %v1634_v30 = vmul.f32 -1.442695, %v1453_v3 }
 0x394   : > { %1744 = vpow2.f32 %v1633_v29 }
 0x395   : > { %1746 = vpow2.f32 %v1634_v30 }
 0x39e   : > { %v1745_v31 = vpop.eup %1744 }
 0x39f   : > { %v1747_v32 = vpop.eup %1746  ;;  %v1461_v33 = vadd.f32 1.0, %v1745_v31 }
 0x3a0   : > { %v1462_v47 = vadd.f32 1.0, %v1747_v32 }
 0x3a1   : > { %1748 = vrcp.f32 %v1461_v33 }
 0x3a2   : > { %1750 = vrcp.f32 %v1462_v47 }
 0x3a9   : > { %1479 = sbr.rel (!%p2457_p8) target bundleno = 971 (0x3cb), region = 64 }
 0x3ab   : > { %v1749_v34 = vpop.eup %1748 }
 0x3ac   : > { %v1751_v1 = vpop.eup %1750 }
 0x3ad   : > { %v1469_v35 = vcombine.low %v1749_v34, %v1751_v1 }
 0x3af   : > { %1471 = vst [vmem:[%s371_s21] sm:$0x77] %v1469_v35 }
 0x3b0   : > { %s2471_s19 = smov (!%p1482_p12, %s1481_s19), 2 }
 0x3b1   : > { %s2379_s10 = sshll.u32 %s2471_s19, 6 }
 0x3b2   : > { %s1486_s14 = ssub.s32 128, %s2379_s10 }
 0x3b3   : > { %1487 = vsyncadd %s1473_s26, %s1486_s14  ;;  %p1638_p0 = scmp.ne.s32.totalorder %s2379_s10, 0  ;;  %s1646_s12 = sshll.u32 %s1953_s9, 7 }
 0x3b4   : > { %s2389_s22 = scalar_lea.hbm %s2439_s8, %s1646_s12  ;;  %s1493_s24 = sshll.u32 %s371_s21, 4  ;;  %s1494_s24 = int_to_ptr.vmem [resolvable:$true] %s1493_s24 }
 0x3b5   : > { %s1808_s23 = scalar_lea.vmem %s1494_s24, %s2379_s10  ;;  %s1886_s15 = smov [#allocation8]  }
 0x3b6   : > { %p1809_p1 = scmp.ne.s32.totalorder %s1494_s24, %s1808_s23  ;;  %s1812_s25 = sshll.u32 %s1886_s15, 4  ;;  %s1813_s25 = int_to_ptr.vmem [resolvable:$false] %s1812_s25 }
 0x3b7   : > { %s1814_s13 = scalar_lea.vmem %s1813_s25, 256  ;;  %p1815_p10 = scmp.lt.s32.totalorder %s1494_s24, %s1813_s25 }
 0x3b8   : > { %p1810_p3 = pnand %p1809_p1, %p1638_p0  ;;  %p1816_p6 = scmp.lt.s32.totalorder %s1814_s13, %s1808_s23 }
 0x3ba   : > { %p1811_p11 = pneg %p1810_p3  ;;  %p1817_p9 = por %p1816_p6, %p1815_p10 }
 0x3bc   : > { %p1818_p2 = pnand %p1817_p9, %p1811_p11 }
 0x3be   : > { %1821 = shalt.err (!%p1818_p2)
}
 0x3bf   : > { %s1822_s9 = scalar_lea.hbm %s2389_s22, %s2379_s10  ;;  %s1826_s16 = scalar_lea.hbm %s2439_s8, 192 }
 0x3c0   : > { %p1823_p13 = scmp.ne.s32.totalorder %s2389_s22, %s1822_s9  ;;  %p1827_p5 = scmp.lt.u32.totalorder %s2389_s22, %s2439_s8 }
 0x3c1   : > { %p1828_p8 = scmp.lt.u32.totalorder %s1826_s16, %s1822_s9  ;;  %p1830_p1 = scmp.lt.u32.totalorder %s1822_s9, %s2389_s22 }
 0x3c2   : > { %p1824_p4 = pnand %p1823_p13, %p1638_p0 }
 0x3c3   : > { %p1829_p12 = por %p1828_p8, %p1827_p5 }
 0x3c4   : > { %p1825_p7 = pneg %p1824_p4 }
 0x3c5   : > { %p1831_p3 = por %p1830_p1, %p1829_p12 }
 0x3c7   : > { %p1832_p11 = pnand %p1831_p3, %p1825_p7 }
 0x3c9   : > { %1835 = shalt.err (!%p1832_p11)
}
 0x3ca   : > { %1496 = dma.vmem_to_hbm [thread:$0]  (%p1638_p0), %s1494_s24, %s2379_s10, %s2389_s22, %s1473_s26  }
 0x3cb PF: > { %s2458_s12 = sld [smem:[#allocation14_spill]]  ;;  %s1505_s17 = sand.u32 1, %s1866_s27  }
 0x3cc   : > { %p2460_p6 = scmp.ge.s32.totalorder %s1878_s30, 2  ;;  %s1506_s18 = scalar_lea.sflag [#allocation5], %s1505_s17 }
 0x3d1   : > { %p2459_p10 = scmp.ne.s32.totalorder %s2458_s12, 0 }
 0x3d3   : > { %p1699_p9 = pnand %p2460_p6, %p2459_p10 }
 0x3d5   : > { %1861 = dma.done.wait (!%p1699_p9), %s1506_s18, 128  }
 0x3d6   : > { %1863 = vsyncadd (!%p1699_p9), %s1506_s18, 4294967168  ;;  %s2461_s30 = sld [smem:[#allocation12_spill]]  ;;  %s2462_s23 = sld [smem:[#allocation13_spill]] }
 0x3d7   : > { %s2463_s27 = smov %s1870_s28  ;;  %s2464_s28 = smov %s1874_s29 }
 0x3dc   : > { %p24_p2 = scmp.ge.s32.totalorder %s2461_s30, 4   ;;  %s2465_s29 = smov %s2462_s23 }
 0x3de   :  { %26 = sbr.rel (!%p24_p2) target bundleno = 7 (0x7), region = 126 }
 0x3e5   :  { %1511 = vsyncpa [#allocation4], 1 }
 0x3e6   :  { %1513 = vsyncpa [#allocation4 + $0x1], 1 }
 0x3e7   :  { %1514 = vsyncpa [#allocation7], 1 }
 0x3e8   :  { %1516 = vsyncpa [#allocation7 + $0x1], 1 }
 0x3e9   :  { %1517 = vsyncpa [#allocation5], 1 }
 0x3ea   :  { %1519 = vsyncpa [#allocation5 + $0x1], 1 }

</bundles_post_ra>
